<compile_context>
chip_gen: v7x
topology: tpu7x:2x2x1
jax: 0.10.0
libtpu: 0.0.40
codegen_flags: <defaults>
</compile_context>

<pallas_src>
import functools

import jax
import jax.numpy as jnp
from jax import lax
from jax.experimental import pallas as pl
from jax.experimental.pallas import tpu as pltpu


def _round_up(x: int, m: int) -> int:
    return ((x + m - 1) // m) * m


def _conv_rows_kernel(x_ref, w_ref, b_ref, o_ref, *, kh, kw, stride, apply_relu):
    """Direct conv for one image / one tile of output rows.

    x_ref: (1, Hp, Wp, Cin)        reflection-padded image (VMEM-resident per image)
    w_ref: (kh*kw, Cin, Cout_pad)  per-tap weights (VMEM-resident across grid)
    b_ref: (1, Cout_pad)           bias, f32 (VMEM-resident)
    o_ref: (1, th, Wo, Cout_pad)   output tile, f32
    """
    th = o_ref.shape[1]
    w_out = o_ref.shape[2]
    cin = x_ref.shape[3]
    m = th * w_out

    r = pl.program_id(1)
    row0 = r * (th * stride)
    if (th * stride) % 8 == 0:
        row0 = pl.multiple_of(row0, 8)

    acc = None
    for dy in range(kh):              # static unroll over taps
        for dx in range(kw):
            if stride == 1:
                sl = x_ref[0, pl.ds(row0 + dy, th), pl.ds(dx, w_out), :]
            else:
                sl = x_ref[0, pl.ds(row0 + dy, th, stride),
                           pl.ds(dx, w_out, stride), :]
            lhs = sl.reshape(m, cin)                       # leading-dim merge only
            part = jnp.dot(lhs, w_ref[dy * kw + dx],
                           preferred_element_type=jnp.float32)
            acc = part if acc is None else acc + part

    acc = acc + b_ref[...]                                 # (m, Cp) + (1, Cp), f32
    if apply_relu:
        acc = jnp.maximum(acc, 0.0)
    o_ref[...] = acc.reshape(o_ref.shape).astype(o_ref.dtype)


def conv_layer_forward(x_nchw, weight, bias, *, stride, is_last=False,
                       target_block_m=512, compute_dtype=jnp.bfloat16):
    """Pallas implementation of ConvLayer.forward.

    x_nchw: (N, Cin, H, W)        float32
    weight: (Cout, Cin, kh, kw)   float32 (PyTorch Conv2d layout)
    bias:   (Cout,)               float32
    returns (N, Cout, Ho, Wo)     float32
    """
    n, cin, h, w = x_nchw.shape
    cout, _, kh, kw = weight.shape
    pad = kh // 2  # reflection_padding = floor(kernel_size / 2)

    # Layout glue in XLA: NCHW -> NHWC + reflection pad (pure data movement).
    x_nhwc = jnp.transpose(x_nchw, (0, 2, 3, 1))
    x_pad = jnp.pad(x_nhwc, ((0, 0), (pad, pad), (pad, pad), (0, 0)), mode="reflect")
    hp, wp = h + 2 * pad, w + 2 * pad
    h_out = (hp - kh) // stride + 1
    w_out = (wp - kw) // stride + 1

    # Tile output rows so each grid step does ~target_block_m matmul rows.
    th = max(1, min(h_out, pl.cdiv(target_block_m, w_out)))
    r_tiles = pl.cdiv(h_out, th)
    h_out_pad = r_tiles * th
    hp_need = (h_out_pad - 1) * stride + kh
    if hp_need > hp:          # keep in-kernel row reads in bounds for pad tiles
        x_pad = jnp.pad(x_pad, ((0, 0), (0, hp_need - hp), (0, 0), (0, 0)))
    x_pad = x_pad.astype(compute_dtype)

    # Lane-dense Cout; per-tap weight layout (kh*kw, Cin, Cout_pad).
    cout_pad = _round_up(cout, 128)
    w_taps = jnp.transpose(weight, (2, 3, 1, 0)).reshape(kh * kw, cin, cout)
    w_p = jnp.pad(w_taps, ((0, 0), (0, 0), (0, cout_pad - cout))).astype(compute_dtype)
    b_p = jnp.pad(bias, (0, cout_pad - cout)).reshape(1, cout_pad).astype(jnp.float32)

    itemsize = jnp.dtype(compute_dtype).itemsize
    x_blk_bytes = hp_need * wp * cin * itemsize
    o_blk_bytes = th * w_out * cout_pad * 4
    w_bytes = kh * kw * cin * cout_pad * itemsize
    vmem_est = 2 * (x_blk_bytes + o_blk_bytes + w_bytes) + 3 * o_blk_bytes + (4 << 20)
    vmem_limit = int(min(64 << 20, max(32 << 20, vmem_est)))

    kernel = functools.partial(_conv_rows_kernel, kh=kh, kw=kw, stride=stride,
                               apply_relu=not is_last)

    out = pl.pallas_call(
        kernel,
        out_shape=jax.ShapeDtypeStruct((n, h_out_pad, w_out, cout_pad), jnp.float32),
        grid_spec=pltpu.PrefetchScalarGridSpec(
            num_scalar_prefetch=0,
            grid=(n, r_tiles),
            in_specs=[
                # Padded image: block index constant across row tiles -> DMA'd
                # once per image, stays VMEM-resident while its rows are tiled.
                pl.BlockSpec((1, hp_need, wp, cin), lambda b, r: (b, 0, 0, 0)),
                # Weights / bias: constant index -> VMEM-resident for whole grid.
                pl.BlockSpec((kh * kw, cin, cout_pad), lambda b, r: (0, 0, 0)),
                pl.BlockSpec((1, cout_pad), lambda b, r: (0, 0)),
            ],
            out_specs=pl.BlockSpec((1, th, w_out, cout_pad),
                                   lambda b, r: (b, r, 0, 0)),
        ),
        compiler_params=pltpu.CompilerParams(
            dimension_semantics=("parallel", "parallel"),   # independent tiles
            vmem_limit_bytes=vmem_limit,
        ),
        cost_estimate=pl.CostEstimate(
            flops=2 * n * h_out_pad * w_out * kh * kw * cin * cout_pad,
            bytes_accessed=(n * x_blk_bytes + w_bytes + cout_pad * 4
                            + n * r_tiles * o_blk_bytes),
            transcendentals=0),
    )(x_pad, w_p, b_p)

    # Drop pad rows/channels, NHWC -> NCHW.
    out = out[:, :h_out, :, :cout]
    # TODO(synk): keep NHWC end-to-end when stacking ConvLayers to skip this transpose.
    return jnp.transpose(out, (0, 3, 1, 2))


def _reference_forward(x_nchw, weight, bias, *, stride, is_last):
    """Pure-JAX reference (reflection pad + conv) for correctness check."""
    pad = weight.shape[2] // 2
    x_pad = jnp.pad(x_nchw, ((0, 0), (0, 0), (pad, pad), (pad, pad)), mode="reflect")
    out = lax.conv_general_dilated(
        x_pad, weight, window_strides=(stride, stride), padding="VALID",
        dimension_numbers=("NCHW", "OIHW", "NCHW"))
    out = out + bias.reshape(1, -1, 1, 1)
    if not is_last:
        out = jnp.maximum(out, 0.0)
    return out


if __name__ == "__main__":
    key = jax.random.PRNGKey(0)
    k_x, k_w, k_b = jax.random.split(key, 3)

    # Small shapes consistent with the module: N=2, Cin=4, H=W=16, Cout=8, k=3, stride=1.
    N, CIN, H, W = 2, 4, 16, 16
    COUT, KSIZE, STRIDE = 8, 3, 1

    x = jax.random.normal(k_x, (N, CIN, H, W), dtype=jnp.float32)
    weight = jax.random.normal(k_w, (COUT, CIN, KSIZE, KSIZE), dtype=jnp.float32) * 0.1
    bias = jax.random.normal(k_b, (COUT,), dtype=jnp.float32) * 0.1

    # ReLU path (is_last=False).
    ref = _reference_forward(x, weight, bias, stride=STRIDE, is_last=False)

    out_f32 = jax.block_until_ready(
        conv_layer_forward(x, weight, bias, stride=STRIDE, is_last=False,
                           compute_dtype=jnp.float32))
    assert out_f32.shape == ref.shape, (out_f32.shape, ref.shape)
    assert jnp.allclose(out_f32, ref, atol=1e-4, rtol=1e-4), "f32 mismatch vs reference"

    out_bf16 = jax.block_until_ready(
        conv_layer_forward(x, weight, bias, stride=STRIDE, is_last=False))
    assert out_bf16.shape == ref.shape, (out_bf16.shape, ref.shape)
    assert jnp.allclose(out_bf16, ref, atol=5e-2, rtol=5e-2), "bf16 mismatch vs reference"

    # No-ReLU path (is_last=True).
    ref_last = _reference_forward(x, weight, bias, stride=STRIDE, is_last=True)
    out_last = jax.block_until_ready(
        conv_layer_forward(x, weight, bias, stride=STRIDE, is_last=True,
                           compute_dtype=jnp.float32))
    assert jnp.allclose(out_last, ref_last, atol=1e-4, rtol=1e-4), "is_last mismatch"

    print("KERNEL_OK")
</pallas_src>

<mosaic_0001>
module attributes {stable_mosaic.version = 11 : i64} {
  func.func @_conv_rows_kernel(%arg0: i32, %arg1: i32, %arg2: memref<1x18x18x4xf32, #tpu.memory_space<vmem>>, %arg3: memref<9x4x128xf32, #tpu.memory_space<vmem>>, %arg4: memref<1x128xf32, #tpu.memory_space<vmem>>, %arg5: memref<1x16x16x128xf32, #tpu.memory_space<vmem>>) attributes {dimension_semantics = [#tpu.dimension_semantics<parallel>, #tpu.dimension_semantics<parallel>], iteration_bounds = array<i64: 2, 1>, scalar_prefetch = 0 : i64, scratch_operands = 0 : i64, tpu.core_type = #tpu.core_type<tc>, window_params = [{transform_indices = @transform_0, window_bounds = array<i64: 1, 18, 18, 4>}, {pipeline_mode = #tpu.pipeline_mode<synchronous>, transform_indices = @transform_1, window_bounds = array<i64: 9, 4, 128>}, {pipeline_mode = #tpu.pipeline_mode<synchronous>, transform_indices = @transform_2, window_bounds = array<i64: 1, 128>}, {transform_indices = @transform_3, window_bounds = array<i64: 1, 16, 16, 128>}]} {
    %c16_i32 = arith.constant 16 : i32
    %0 = arith.muli %arg1, %c16_i32 : i32
    %1 = tpu.assume_multiple %0, 8 : i32
    %c0_i32 = arith.constant 0 : i32
    %2 = arith.addi %1, %c0_i32 : i32
    %c0 = arith.constant 0 : index
    %3 = arith.index_cast %2 : i32 to index
    %c0_0 = arith.constant 0 : index
    %c0_1 = arith.constant 0 : index
    %4 = vector.load %arg2[%c0, %3, %c0_0, %c0_1] : memref<1x18x18x4xf32, #tpu.memory_space<vmem>>, vector<1x16x16x4xf32>
    %5 = vector.shape_cast %4 : vector<1x16x16x4xf32> to vector<16x16x4xf32>
    %6 = vector.shape_cast %5 : vector<16x16x4xf32> to vector<256x4xf32>
    %c0_2 = arith.constant 0 : index
    %c0_3 = arith.constant 0 : index
    %c0_4 = arith.constant 0 : index
    %7 = vector.load %arg3[%c0_2, %c0_3, %c0_4] : memref<9x4x128xf32, #tpu.memory_space<vmem>>, vector<1x4x128xf32>
    %8 = vector.shape_cast %7 : vector<1x4x128xf32> to vector<4x128xf32>
    %cst = arith.constant dense<0.000000e+00> : vector<256x128xf32>
    %9 = tpu.matmul %6, %8, %cst {dimension_numbers = #tpu.dot_dimension_numbers<[1], [0], [0], [1], [0, 0, 1, 1], [], []>} : vector<256x4xf32>, vector<4x128xf32>, vector<256x128xf32> -> vector<256x128xf32>
    %c0_i32_5 = arith.constant 0 : i32
    %10 = arith.addi %1, %c0_i32_5 : i32
    %c0_6 = arith.constant 0 : index
    %11 = arith.index_cast %10 : i32 to index
    %c1 = arith.constant 1 : index
    %c0_7 = arith.constant 0 : index
    %12 = vector.load %arg2[%c0_6, %11, %c1, %c0_7] : memref<1x18x18x4xf32, #tpu.memory_space<vmem>>, vector<1x16x16x4xf32>
    %13 = vector.shape_cast %12 : vector<1x16x16x4xf32> to vector<16x16x4xf32>
    %14 = vector.shape_cast %13 : vector<16x16x4xf32> to vector<256x4xf32>
    %c1_8 = arith.constant 1 : index
    %c0_9 = arith.constant 0 : index
    %c0_10 = arith.constant 0 : index
    %15 = vector.load %arg3[%c1_8, %c0_9, %c0_10] : memref<9x4x128xf32, #tpu.memory_space<vmem>>, vector<1x4x128xf32>
    %16 = vector.shape_cast %15 : vector<1x4x128xf32> to vector<4x128xf32>
    %cst_11 = arith.constant dense<0.000000e+00> : vector<256x128xf32>
    %17 = tpu.matmul %14, %16, %cst_11 {dimension_numbers = #tpu.dot_dimension_numbers<[1], [0], [0], [1], [0, 0, 1, 1], [], []>} : vector<256x4xf32>, vector<4x128xf32>, vector<256x128xf32> -> vector<256x128xf32>
    %18 = arith.addf %9, %17 : vector<256x128xf32>
    %c0_i32_12 = arith.constant 0 : i32
    %19 = arith.addi %1, %c0_i32_12 : i32
    %c0_13 = arith.constant 0 : index
    %20 = arith.index_cast %19 : i32 to index
    %c2 = arith.constant 2 : index
    %c0_14 = arith.constant 0 : index
    %21 = vector.load %arg2[%c0_13, %20, %c2, %c0_14] : memref<1x18x18x4xf32, #tpu.memory_space<vmem>>, vector<1x16x16x4xf32>
    %22 = vector.shape_cast %21 : vector<1x16x16x4xf32> to vector<16x16x4xf32>
    %23 = vector.shape_cast %22 : vector<16x16x4xf32> to vector<256x4xf32>
    %c2_15 = arith.constant 2 : index
    %c0_16 = arith.constant 0 : index
    %c0_17 = arith.constant 0 : index
    %24 = vector.load %arg3[%c2_15, %c0_16, %c0_17] : memref<9x4x128xf32, #tpu.memory_space<vmem>>, vector<1x4x128xf32>
    %25 = vector.shape_cast %24 : vector<1x4x128xf32> to vector<4x128xf32>
    %cst_18 = arith.constant dense<0.000000e+00> : vector<256x128xf32>
    %26 = tpu.matmul %23, %25, %cst_18 {dimension_numbers = #tpu.dot_dimension_numbers<[1], [0], [0], [1], [0, 0, 1, 1], [], []>} : vector<256x4xf32>, vector<4x128xf32>, vector<256x128xf32> -> vector<256x128xf32>
    %27 = arith.addf %18, %26 : vector<256x128xf32>
    %c1_i32 = arith.constant 1 : i32
    %28 = arith.addi %1, %c1_i32 : i32
    %c0_19 = arith.constant 0 : index
    %29 = arith.index_cast %28 : i32 to index
    %c0_20 = arith.constant 0 : index
    %c0_21 = arith.constant 0 : index
    %30 = vector.load %arg2[%c0_19, %29, %c0_20, %c0_21] : memref<1x18x18x4xf32, #tpu.memory_space<vmem>>, vector<1x16x16x4xf32>
    %31 = vector.shape_cast %30 : vector<1x16x16x4xf32> to vector<16x16x4xf32>
    %32 = vector.shape_cast %31 : vector<16x16x4xf32> to vector<256x4xf32>
    %c3 = arith.constant 3 : index
    %c0_22 = arith.constant 0 : index
    %c0_23 = arith.constant 0 : index
    %33 = vector.load %arg3[%c3, %c0_22, %c0_23] : memref<9x4x128xf32, #tpu.memory_space<vmem>>, vector<1x4x128xf32>
    %34 = vector.shape_cast %33 : vector<1x4x128xf32> to vector<4x128xf32>
    %cst_24 = arith.constant dense<0.000000e+00> : vector<256x128xf32>
    %35 = tpu.matmul %32, %34, %cst_24 {dimension_numbers = #tpu.dot_dimension_numbers<[1], [0], [0], [1], [0, 0, 1, 1], [], []>} : vector<256x4xf32>, vector<4x128xf32>, vector<256x128xf32> -> vector<256x128xf32>
    %36 = arith.addf %27, %35 : vector<256x128xf32>
    %c1_i32_25 = arith.constant 1 : i32
    %37 = arith.addi %1, %c1_i32_25 : i32
    %c0_26 = arith.constant 0 : index
    %38 = arith.index_cast %37 : i32 to index
    %c1_27 = arith.constant 1 : index
    %c0_28 = arith.constant 0 : index
    %39 = vector.load %arg2[%c0_26, %38, %c1_27, %c0_28] : memref<1x18x18x4xf32, #tpu.memory_space<vmem>>, vector<1x16x16x4xf32>
    %40 = vector.shape_cast %39 : vector<1x16x16x4xf32> to vector<16x16x4xf32>
    %41 = vector.shape_cast %40 : vector<16x16x4xf32> to vector<256x4xf32>
    %c4 = arith.constant 4 : index
    %c0_29 = arith.constant 0 : index
    %c0_30 = arith.constant 0 : index
    %42 = vector.load %arg3[%c4, %c0_29, %c0_30] : memref<9x4x128xf32, #tpu.memory_space<vmem>>, vector<1x4x128xf32>
    %43 = vector.shape_cast %42 : vector<1x4x128xf32> to vector<4x128xf32>
    %cst_31 = arith.constant dense<0.000000e+00> : vector<256x128xf32>
    %44 = tpu.matmul %41, %43, %cst_31 {dimension_numbers = #tpu.dot_dimension_numbers<[1], [0], [0], [1], [0, 0, 1, 1], [], []>} : vector<256x4xf32>, vector<4x128xf32>, vector<256x128xf32> -> vector<256x128xf32>
    %45 = arith.addf %36, %44 : vector<256x128xf32>
    %c1_i32_32 = arith.constant 1 : i32
    %46 = arith.addi %1, %c1_i32_32 : i32
    %c0_33 = arith.constant 0 : index
    %47 = arith.index_cast %46 : i32 to index
    %c2_34 = arith.constant 2 : index
    %c0_35 = arith.constant 0 : index
    %48 = vector.load %arg2[%c0_33, %47, %c2_34, %c0_35] : memref<1x18x18x4xf32, #tpu.memory_space<vmem>>, vector<1x16x16x4xf32>
    %49 = vector.shape_cast %48 : vector<1x16x16x4xf32> to vector<16x16x4xf32>
    %50 = vector.shape_cast %49 : vector<16x16x4xf32> to vector<256x4xf32>
    %c5 = arith.constant 5 : index
    %c0_36 = arith.constant 0 : index
    %c0_37 = arith.constant 0 : index
    %51 = vector.load %arg3[%c5, %c0_36, %c0_37] : memref<9x4x128xf32, #tpu.memory_space<vmem>>, vector<1x4x128xf32>
    %52 = vector.shape_cast %51 : vector<1x4x128xf32> to vector<4x128xf32>
    %cst_38 = arith.constant dense<0.000000e+00> : vector<256x128xf32>
    %53 = tpu.matmul %50, %52, %cst_38 {dimension_numbers = #tpu.dot_dimension_numbers<[1], [0], [0], [1], [0, 0, 1, 1], [], []>} : vector<256x4xf32>, vector<4x128xf32>, vector<256x128xf32> -> vector<256x128xf32>
    %54 = arith.addf %45, %53 : vector<256x128xf32>
    %c2_i32 = arith.constant 2 : i32
    %55 = arith.addi %1, %c2_i32 : i32
    %c0_39 = arith.constant 0 : index
    %56 = arith.index_cast %55 : i32 to index
    %c0_40 = arith.constant 0 : index
    %c0_41 = arith.constant 0 : index
    %57 = vector.load %arg2[%c0_39, %56, %c0_40, %c0_41] : memref<1x18x18x4xf32, #tpu.memory_space<vmem>>, vector<1x16x16x4xf32>
    %58 = vector.shape_cast %57 : vector<1x16x16x4xf32> to vector<16x16x4xf32>
    %59 = vector.shape_cast %58 : vector<16x16x4xf32> to vector<256x4xf32>
    %c6 = arith.constant 6 : index
    %c0_42 = arith.constant 0 : index
    %c0_43 = arith.constant 0 : index
    %60 = vector.load %arg3[%c6, %c0_42, %c0_43] : memref<9x4x128xf32, #tpu.memory_space<vmem>>, vector<1x4x128xf32>
    %61 = vector.shape_cast %60 : vector<1x4x128xf32> to vector<4x128xf32>
    %cst_44 = arith.constant dense<0.000000e+00> : vector<256x128xf32>
    %62 = tpu.matmul %59, %61, %cst_44 {dimension_numbers = #tpu.dot_dimension_numbers<[1], [0], [0], [1], [0, 0, 1, 1], [], []>} : vector<256x4xf32>, vector<4x128xf32>, vector<256x128xf32> -> vector<256x128xf32>
    %63 = arith.addf %54, %62 : vector<256x128xf32>
    %c2_i32_45 = arith.constant 2 : i32
    %64 = arith.addi %1, %c2_i32_45 : i32
    %c0_46 = arith.constant 0 : index
    %65 = arith.index_cast %64 : i32 to index
    %c1_47 = arith.constant 1 : index
    %c0_48 = arith.constant 0 : index
    %66 = vector.load %arg2[%c0_46, %65, %c1_47, %c0_48] : memref<1x18x18x4xf32, #tpu.memory_space<vmem>>, vector<1x16x16x4xf32>
    %67 = vector.shape_cast %66 : vector<1x16x16x4xf32> to vector<16x16x4xf32>
    %68 = vector.shape_cast %67 : vector<16x16x4xf32> to vector<256x4xf32>
    %c7 = arith.constant 7 : index
    %c0_49 = arith.constant 0 : index
    %c0_50 = arith.constant 0 : index
    %69 = vector.load %arg3[%c7, %c0_49, %c0_50] : memref<9x4x128xf32, #tpu.memory_space<vmem>>, vector<1x4x128xf32>
    %70 = vector.shape_cast %69 : vector<1x4x128xf32> to vector<4x128xf32>
    %cst_51 = arith.constant dense<0.000000e+00> : vector<256x128xf32>
    %71 = tpu.matmul %68, %70, %cst_51 {dimension_numbers = #tpu.dot_dimension_numbers<[1], [0], [0], [1], [0, 0, 1, 1], [], []>} : vector<256x4xf32>, vector<4x128xf32>, vector<256x128xf32> -> vector<256x128xf32>
    %72 = arith.addf %63, %71 : vector<256x128xf32>
    %c2_i32_52 = arith.constant 2 : i32
    %73 = arith.addi %1, %c2_i32_52 : i32
    %c0_53 = arith.constant 0 : index
    %74 = arith.index_cast %73 : i32 to index
    %c2_54 = arith.constant 2 : index
    %c0_55 = arith.constant 0 : index
    %75 = vector.load %arg2[%c0_53, %74, %c2_54, %c0_55] : memref<1x18x18x4xf32, #tpu.memory_space<vmem>>, vector<1x16x16x4xf32>
    %76 = vector.shape_cast %75 : vector<1x16x16x4xf32> to vector<16x16x4xf32>
    %77 = vector.shape_cast %76 : vector<16x16x4xf32> to vector<256x4xf32>
    %c8 = arith.constant 8 : index
    %c0_56 = arith.constant 0 : index
    %c0_57 = arith.constant 0 : index
    %78 = vector.load %arg3[%c8, %c0_56, %c0_57] : memref<9x4x128xf32, #tpu.memory_space<vmem>>, vector<1x4x128xf32>
    %79 = vector.shape_cast %78 : vector<1x4x128xf32> to vector<4x128xf32>
    %cst_58 = arith.constant dense<0.000000e+00> : vector<256x128xf32>
    %80 = tpu.matmul %77, %79, %cst_58 {dimension_numbers = #tpu.dot_dimension_numbers<[1], [0], [0], [1], [0, 0, 1, 1], [], []>} : vector<256x4xf32>, vector<4x128xf32>, vector<256x128xf32> -> vector<256x128xf32>
    %81 = arith.addf %72, %80 : vector<256x128xf32>
    %c0_59 = arith.constant 0 : index
    %c0_60 = arith.constant 0 : index
    %82 = vector.load %arg4[%c0_59, %c0_60] : memref<1x128xf32, #tpu.memory_space<vmem>>, vector<1x128xf32>
    %83 = vector.broadcast %82 : vector<1x128xf32> to vector<256x128xf32>
    %84 = arith.addf %81, %83 : vector<256x128xf32>
    %cst_61 = arith.constant 0.000000e+00 : f32
    %85 = vector.broadcast %cst_61 : f32 to vector<256x128xf32>
    %86 = arith.maximumf %84, %85 : vector<256x128xf32>
    %87 = vector.shape_cast %86 : vector<256x128xf32> to vector<1x16x16x128xf32>
    %c0_62 = arith.constant 0 : index
    %c0_63 = arith.constant 0 : index
    %c0_64 = arith.constant 0 : index
    %c0_65 = arith.constant 0 : index
    %88 = vector.load %arg5[%c0_62, %c0_63, %c0_64, %c0_65] : memref<1x16x16x128xf32, #tpu.memory_space<vmem>>, vector<1x16x16x128xf32>
    tpu.vector_store %arg5[%c0_62, %c0_63, %c0_64, %c0_65], %87 {strides = array<i32>} : memref<1x16x16x128xf32, #tpu.memory_space<vmem>>, vector<1x16x16x128xf32>,
    return
  }
  func.func @transform_0(%arg0: i32, %arg1: i32) -> (i32, i32, i32, i32) {
    %c0_i32 = arith.constant 0 : i32
    %c0_i32_0 = arith.constant 0 : i32
    %c0_i32_1 = arith.constant 0 : i32
    %c0_i32_2 = arith.constant 0 : i32
    return %arg0, %c0_i32, %c0_i32_0, %c0_i32_1 : i32, i32, i32, i32
  }
  func.func @transform_1(%arg0: i32, %arg1: i32) -> (i32, i32, i32) {
    %c0_i32 = arith.constant 0 : i32
    %c0_i32_0 = arith.constant 0 : i32
    %c0_i32_1 = arith.constant 0 : i32
    %c0_i32_2 = arith.constant 0 : i32
    return %c0_i32, %c0_i32_0, %c0_i32_1 : i32, i32, i32
  }
  func.func @transform_2(%arg0: i32, %arg1: i32) -> (i32, i32) {
    %c0_i32 = arith.constant 0 : i32
    %c0_i32_0 = arith.constant 0 : i32
    %c0_i32_1 = arith.constant 0 : i32
    return %c0_i32, %c0_i32_0 : i32, i32
  }
  func.func @transform_3(%arg0: i32, %arg1: i32) -> (i32, i32, i32, i32) {
    %c0_i32 = arith.constant 0 : i32
    %c0_i32_0 = arith.constant 0 : i32
    %c0_i32_1 = arith.constant 0 : i32
    return %arg0, %arg1, %c0_i32, %c0_i32_0 : i32, i32, i32, i32
  }
}

</mosaic_0001>

<bundles_post_ra>
// kernel: tpu_custom_call.1
= control target key start
LH: loop header
LB: loop body
LE: loop exit
PB: predicated region body
PF: predicated region fallthrough
CT: control target
= control target key end

     0   :  { %8 = vsyncpa [#allocation3], 0  ;;  %s6650_s0 = inlined_call_operand.vmem [shape: f32[2,18,18,4], index: 0, kind: input, shape index: {}]   ;;  %s6651_s1 = inlined_call_operand.vmem [shape: f32[9,4,128], index: 1, kind: input, shape index: {}]   ;;  %s6652_s2 = inlined_call_operand.vmem [shape: f32[1,128], index: 2, kind: input, shape index: {}]   ;;  %s6653_s3 = inlined_call_operand.hbm [shape: f32[2,16,16,128], index: 3, kind: output, shape index: {}]  }
   0x1   :  { %10 = vsyncpa [#allocation3 + $0x1], 0  ;;  %s5520_s12 = smov 0   ;;  %s5522_s13 = smov 0  }
   0x2   :  { %s5524_s14 = smov 0   ;;  %s5526_s15 = smov 0  }
   0x3   :  { %s5528_s16 = smov 0   ;;  %s5530_s17 = smov 0  }
   0x4 LB: > { %s3843_s18 = sadd.s32 4294967295, %s5495_s17   ;;  %s3844_s19 = sadd.s32 4294967294, %s5495_s17   ;;  %s5495_s17 = sphi %s5530_s17, %s16_s17   ;;  %s5491_s16 = sphi %s5528_s16, %s6769_s16   ;;  %s5487_s15 = sphi %s5526_s15, %s6768_s15   ;;  %s5483_s14 = sphi %s5524_s14, %s6767_s14   ;;  %s5479_s13 = sphi %s5522_s13, %s6766_s13   ;;  %s5475_s12 = sphi %s5520_s12, %s6765_s12  }
   0x5   : > { %s28_s20 = sadd.s32 1, %s5491_s16  ;;  %s105_s21 = sadd.s32 1, %s5483_s14 }
   0x6   : > { %p30_p0 = scmp.ge.s32.totalorder %s28_s20, 2  ;;  %p115_p1 = scmp.ne.s32.totalorder %s5483_s14, %s5479_s13 }
   0x7   : > { %p116_p2 = scmp.eq.s32.totalorder %s3843_s18, 1  ;;  %p121_p3 = scmp.ne.s32.totalorder %s5479_s13, %s5475_s12 }
   0x8   : > { %s6771_s20 = smov (%p30_p0, %s28_s20), 0  ;;  %p122_p5 = scmp.eq.s32.totalorder %s3844_s19, 1 }
   0x9   : > { %p5560_p4 = por %p116_p2, %p115_p1  ;;  %s100_s23 = ssub.s32 %s5491_s16, %s6771_s20 }
   0xa   : > { %p3847_p6 = scmp.ge.s32.totalorder %s5495_s17, 1  ;;  %p103_p7 = scmp.eq.s32.totalorder %s100_s23, 0 }
   0xb   : > { %p5567_p8 = por %p122_p5, %p121_p3  ;;  %p154_p9 = scmp.lt.s32.totalorder %s5495_s17, 3 }
   0xc   : > { %s5573_s25 = scalar_select %p103_p7, %s5483_s14, %s105_s21  }
   0xd   : > { %p155_p10 = pnand %p3847_p6, %p154_p9 }
   0xf   : > { %158 = sbr.rel (%p155_p10) target bundleno = 549 (0x225), region = 32 }
  0x16   : > { %v3850_v0 = vld [vmem:[%s6651_s1 + $0x4] sm:$0xf]  ;;  %vm351_vm0 = vcmask 1043456   ;;  %v5581_v1 = vld [vmem:[%s6651_s1 + $0x10] sm:$0xf]  ;;  %p178_p11 = scmp.lt.s32.totalorder %s5487_s15, 1 }
  0x17   : > { %4651 = vmatprep.subr.msk.mxu1 %vm351_vm0, %v3850_v0  ;;  %4851 = vmatprep.subr.msk.mxu0 %vm351_vm0, %v5581_v1  ;;  %v219_v2 = vld [vmem:[%s6651_s1] sm:$0xf]  ;;  %v4115_v3 = vld [vmem:[%s6651_s1 + $0x14] sm:$0xf]  ;;  %vm254_vm1 = vcmask 31744   ;;  %s175_s5 = sand.u32 1, %s5479_s13  }
  0x18   : > { %4652 = vmatpush3.msk.msra.mxu1 %vm351_vm0, %v3850_v0  ;;  %4852 = vmatpush3.msk.msra.mxu0 %vm351_vm0, %v5581_v1  ;;  %s179_s7 = scalar_select %p178_p11, %s5487_s15, 1  ;;  %v4181_v9 = vld [vmem:[%s6651_s1 + $0x18] sm:$0xf]  ;;  %v5621_v10 = vld [vmem:[%s6651_s1 + $0x8] sm:$0xf] }
  0x19   : > { %4701 = vmatprep.subr.msk.mxu1 %vm351_vm0, %v219_v2  ;;  %4901 = vmatprep.subr.msk.mxu0 %vm351_vm0, %v4115_v3  ;;  %v5740_v28 = vld [vmem:[%s6651_s1 + $0x1c] sm:$0xf]  ;;  %v5903_v61 = vld [vmem:[%s6651_s1 + $0xc] sm:$0xf]  ;;  %s4353_s10 = sshll.u32 %s5487_s15, 12  ;;  %s6604_s15 = scalar_lea.sflag [#allocation3], %s175_s5 }
  0x1a   : > { %s5359_s8 = smul.u32 432, %s179_s7  ;;  %s6596_s21 = scalar_lea.hbm %s6653_s3, %s4353_s10 }
  0x1b   : > { %s5497_s26 = smov [#allocation2]  }
  0x1c   : > { %s5602_s11 = scalar_lea.vmem %s6650_s0, %s5359_s8  ;;  %s3848_s8 = sshll.u32 %s175_s5, 8 }
  0x1d   : > { %v220_v4 = vld [vmem:[%s5602_s11 + $0x1] sm:$0xff]  ;;  %v4017_v5 = vld [vmem:[%s5602_s11 + $0x19] sm:$0xff]  ;;  %v221_v6 = vld [vmem:[%s5602_s11 + $0x9] sm:$0xff]  ;;  %s6525_s9 = scalar_lea.vmem [#allocation2], %s3848_s8  ;;  %s5421_s27 = sshll.u32 %s5497_s26, 4  ;;  %s5422_s27 = int_to_ptr.vmem [resolvable:$false] %s5421_s27 }
  0x1e   : > { %4653 = vmatprep.mubr.msk.f32.mxu1 %vm254_vm1, %v220_v4  ;;  %4853 = vmatprep.mubr.msk.f32.mxu0 %vm254_vm1, %v4017_v5  ;;  %v4018_v7 = vld [vmem:[%s5602_s11 + $0x21] sm:$0xff]  ;;  %v5611_v8 = vld [vmem:[%s5602_s11 + $0x31] sm:$0xff]  ;;  %v5626_v11 = vld [vmem:[%s5602_s11 + $0x39] sm:$0xff]  ;;  %s5423_s28 = scalar_lea.vmem %s5422_s27, 8192 }
  0x1f   : > { %4654 = vmatmul.mubr.msk.f32.vlgmr.msra.gmra.mrb[0].mxu1 %vm254_vm1, %v221_v6  ;;  %4854 = vmatmul.mubr.msk.f32.vlgmr.msra.gmra.mrb[0].mxu0 %vm254_vm1, %v4018_v7  ;;  %v5632_v12 = vld [vmem:[%s5602_s11 + $0x49] sm:$0xff]  ;;  %v5645_v13 = vld [vmem:[%s5602_s11 + $0x51] sm:$0xff]  ;;  %v5648_v14 = vld [vmem:[%s5602_s11 + $0x61] sm:$0xff] }
  0x20   : > { %4702 = vmatpush3.msk.msra.mxu1 %vm351_vm0, %v219_v2  ;;  %4902 = vmatpush3.msk.msra.mxu0 %vm351_vm0, %v4115_v3  ;;  %v5659_v15 = vld [vmem:[%s5602_s11 + $0x69] sm:$0xff]  ;;  %v5662_v16 = vld [vmem:[%s5602_s11 + $0x79] sm:$0xff]  ;;  %v5673_v17 = vld [vmem:[%s5602_s11 + $0x81] sm:$0xff] }
  0x21   : > { %4656 = vmatprep.mubr.msk.f32.mxu1 %vm254_vm1, %v4017_v5  ;;  %4856 = vmatprep.mubr.msk.f32.mxu0 %vm254_vm1, %v5611_v8  ;;  %v5676_v18 = vld [vmem:[%s5602_s11 + $0x91] sm:$0xff]  ;;  %v5687_v19 = vld [vmem:[%s5602_s11 + $0x99] sm:$0xff]  ;;  %v5690_v20 = vld [vmem:[%s5602_s11 + $0xa9] sm:$0xff] }
  0x22   : > { %4951 = vmatprep.subr.msk.mxu0 %vm351_vm0, %v4181_v9  ;;  %4751 = vmatprep.subr.msk.mxu1 %vm351_vm0, %v5621_v10  ;;  %v5701_v21 = vld [vmem:[%s5602_s11 + $0xb1] sm:$0xff]  ;;  %v5704_v22 = vld [vmem:[%s5602_s11 + $0xc1] sm:$0xff]  ;;  %v5715_v23 = vld [vmem:[%s5602_s11 + $0xc9] sm:$0xff] }
  0x23   : > { %4657 = vmatmul.mubr.msk.f32.gmra.mrb[2].mxu1 %vm254_vm1, %v4018_v7  ;;  %4857 = vmatmul.mubr.msk.f32.gmra.mrb[2].mxu0 %vm254_vm1, %v5626_v11  ;;  %v5718_v24 = vld [vmem:[%s5602_s11 + $0x1a] sm:$0xff]  ;;  %v5729_v25 = vld [vmem:[%s5602_s11 + $0x22] sm:$0xff]  ;;  %v5735_v27 = vld [vmem:[%s5602_s11 + $0x32] sm:$0xff] }
  0x24   : > { %4659 = vmatprep.mubr.msk.f32.mxu1 %vm254_vm1, %v5611_v8  ;;  %4859 = vmatprep.mubr.msk.f32.mxu0 %vm254_vm1, %v5632_v12  ;;  %v5732_v26 = vld [vmem:[%s5602_s11 + $0xd9] sm:$0xff]  ;;  %v5750_v29 = vld [vmem:[%s5602_s11 + $0xe1] sm:$0xff]  ;;  %v5758_v31 = vld [vmem:[%s5602_s11 + $0xf1] sm:$0xff] }
  0x25   : > { %6701 = vst [vmem:[#allocation5_spill] sm:$0xff] %v5750_v29  ;;  %v5753_v30 = vld [vmem:[%s5602_s11 + $0x3a] sm:$0xff]  ;;  %6702 = vst [vmem:[#allocation6_spill] sm:$0xff] %v5758_v31  ;;  %v5761_v32 = vld [vmem:[%s5602_s11 + $0x4a] sm:$0xff] }
  0x26   : > { %v5774_v33 = vld [vmem:[%s5602_s11 + $0xf9] sm:$0xff]  ;;  %v5780_v35 = vld [vmem:[%s5602_s11 + $0x109] sm:$0xff]  ;;  %v5794_v37 = vld [vmem:[%s5602_s11 + $0x111] sm:$0xff] }
  0x27   : > { %4660 = vmatmul.mubr.msk.f32.gmra.mrb[4].mxu1 %vm254_vm1, %v5626_v11  ;;  %4860 = vmatmul.mubr.msk.f32.gmra.mrb[4].mxu0 %vm254_vm1, %v5645_v13  ;;  %6703 = vst [vmem:[#allocation7_spill] sm:$0xff] %v5774_v33  ;;  %v5777_v34 = vld [vmem:[%s5602_s11 + $0x52] sm:$0xff]  ;;  %6704 = vst [vmem:[#allocation8_spill] sm:$0xff] %v5780_v35  ;;  %v5783_v36 = vld [vmem:[%s5602_s11 + $0x62] sm:$0xff] }
  0x28   : > { %4662 = vmatprep.mubr.msk.f32.mxu1 %vm254_vm1, %v5632_v12  ;;  %4862 = vmatprep.mubr.msk.f32.mxu0 %vm254_vm1, %v5648_v14  ;;  %6705 = vst [vmem:[#allocation9_spill] sm:$0xff] %v5794_v37  ;;  %v5797_v38 = vld [vmem:[%s5602_s11 + $0x6a] sm:$0xff]  ;;  %v5800_v39 = vld [vmem:[%s5602_s11 + $0x121] sm:$0xff]  ;;  %v5820_v43 = vld [vmem:[%s5602_s11 + $0x139] sm:$0xff] }
  0x29   : > { %6706 = vst [vmem:[#allocation10_spill] sm:$0xff] %v5800_v39  ;;  %v5803_v40 = vld [vmem:[%s5602_s11 + $0x7a] sm:$0xff]  ;;  %v5814_v41 = vld [vmem:[%s5602_s11 + $0x129] sm:$0xff]  ;;  %6708 = vst [vmem:[#allocation12_spill] sm:$0xff] %v5820_v43 }
  0x2a   : > { %6707 = vst [vmem:[#allocation11_spill] sm:$0xff] %v5814_v41  ;;  %v5817_v42 = vld [vmem:[%s5602_s11 + $0x82] sm:$0xff]  ;;  %v5823_v44 = vld [vmem:[%s5602_s11 + $0x92] sm:$0xff]  ;;  %v5837_v46 = vld [vmem:[%s5602_s11 + $0x9a] sm:$0xff] }
  0x2b   : > { %4663 = vmatmul.mubr.msk.f32.gmra.mrb[6].mxu1 %vm254_vm1, %v5645_v13  ;;  %4863 = vmatmul.mubr.msk.f32.gmra.mrb[6].mxu0 %vm254_vm1, %v5659_v15  ;;  %v5834_v45 = vld [vmem:[%s5602_s11 + $0x141] sm:$0xff]  ;;  %v5840_v47 = vld [vmem:[%s5602_s11 + $0x151] sm:$0xff]  ;;  %v5854_v49 = vld [vmem:[%s5602_s11 + $0x159] sm:$0xff] }
  0x2c   : > { %4665 = vmatprep.mubr.msk.f32.mxu1 %vm254_vm1, %v5648_v14  ;;  %4865 = vmatprep.mubr.msk.f32.mxu0 %vm254_vm1, %v5662_v16  ;;  %6709 = vst [vmem:[#allocation13_spill] sm:$0xff] %v5834_v45  ;;  %6710 = vst [vmem:[#allocation14_spill] sm:$0xff] %v5840_v47  ;;  %v5843_v48 = vld [vmem:[%s5602_s11 + $0xaa] sm:$0xff]  ;;  %v5857_v50 = vld [vmem:[%s5602_s11 + $0xb2] sm:$0xff] }
  0x2d   : > { %6711 = vst [vmem:[#allocation15_spill] sm:$0xff] %v5854_v49  ;;  %v5860_v51 = vld [vmem:[%s5602_s11 + $0x169] sm:$0xff]  ;;  %v5874_v53 = vld [vmem:[%s5602_s11 + $0x171] sm:$0xff]  ;;  %v187_v55 = vld [vmem:[%s5602_s11] sm:$0xff] }
  0x2e   : > { %6712 = vst [vmem:[#allocation16_spill] sm:$0xff] %v5860_v51  ;;  %v5863_v52 = vld [vmem:[%s5602_s11 + $0xc2] sm:$0xff]  ;;  %6713 = vst [vmem:[#allocation17_spill] sm:$0xff] %v5874_v53  ;;  %v5877_v54 = vld [vmem:[%s5602_s11 + $0xca] sm:$0xff] }
  0x2f   : > { %4666 = vmatmul.mubr.msk.f32.gmra.mrb[8].mxu1 %vm254_vm1, %v5659_v15  ;;  %4866 = vmatmul.mubr.msk.f32.gmra.mrb[8].mxu0 %vm254_vm1, %v5673_v17  ;;  %v5881_v56 = vld [vmem:[%s5602_s11 + $0xda] sm:$0xff]  ;;  %v188_v57 = vld [vmem:[%s5602_s11 + $0x8] sm:$0xff]  ;;  %v5898_v60 = vld [vmem:[%s5602_s11 + $0xf2] sm:$0xff] }
  0x30   : > { %4668 = vmatprep.mubr.msk.f32.mxu1 %vm254_vm1, %v5662_v16  ;;  %4868 = vmatprep.mubr.msk.f32.mxu0 %vm254_vm1, %v5676_v18  ;;  %v5892_v58 = vld [vmem:[%s5602_s11 + $0xe2] sm:$0xff]  ;;  %v5895_v59 = vld [vmem:[%s5602_s11 + $0x18] sm:$0xff]  ;;  %v5921_v0 = vld [vmem:[%s5602_s11 + $0x30] sm:$0xff] }
  0x31   : > { %6714 = vst [vmem:[#allocation18_spill] sm:$0xff] %v5895_v59  ;;  %v5913_v62 = vld [vmem:[%s5602_s11 + $0x20] sm:$0xff]  ;;  %6716 = vst [vmem:[#allocation20_spill] sm:$0xff] %v5921_v0  ;;  %v5924_v2 = vld [vmem:[%s5602_s11 + $0x10a] sm:$0xff] }
  0x32   : > { %6715 = vst [vmem:[#allocation19_spill] sm:$0xff] %v5913_v62  ;;  %v5916_v63 = vld [vmem:[%s5602_s11 + $0xfa] sm:$0xff]  ;;  %v5940_v4 = vld [vmem:[%s5602_s11 + $0x112] sm:$0xff]  ;;  %v5943_v5 = vld [vmem:[%s5602_s11 + $0x48] sm:$0xff] }
  0x33   : > { %4669 = vmatmul.mubr.msk.f32.gmra.mrb[10].mxu1 %vm254_vm1, %v5673_v17  ;;  %4869 = vmatmul.mubr.msk.f32.gmra.mrb[10].mxu0 %vm254_vm1, %v5687_v19  ;;  %v5937_v3 = vld [vmem:[%s5602_s11 + $0x38] sm:$0xff]  ;;  %6718 = vst [vmem:[#allocation22_spill] sm:$0xff] %v5943_v5  ;;  %v5946_v6 = vld [vmem:[%s5602_s11 + $0x122] sm:$0xff]  ;;  %v5957_v7 = vld [vmem:[%s5602_s11 + $0x50] sm:$0xff] }
  0x34   : > { %4671 = vmatprep.mubr.msk.f32.mxu1 %vm254_vm1, %v5676_v18  ;;  %4871 = vmatprep.mubr.msk.f32.mxu0 %vm254_vm1, %v5690_v20  ;;  %6717 = vst [vmem:[#allocation21_spill] sm:$0xff] %v5937_v3  ;;  %6719 = vst [vmem:[#allocation23_spill] sm:$0xff] %v5957_v7 }
  0x37   : > { %4672 = vmatmul.mubr.msk.f32.gmra.mrb[12].mxu1 %vm254_vm1, %v5687_v19  ;;  %4872 = vmatmul.mubr.msk.f32.gmra.mrb[12].mxu0 %vm254_vm1, %v5701_v21 }
  0x38   : > { %4674 = vmatprep.mubr.msk.f32.mxu1 %vm254_vm1, %v5690_v20  ;;  %4874 = vmatprep.mubr.msk.f32.mxu0 %vm254_vm1, %v5704_v22 }
  0x3b   : > { %4675 = vmatmul.mubr.msk.f32.gmra.mrb[14].mxu1 %vm254_vm1, %v5701_v21  ;;  %4875 = vmatmul.mubr.msk.f32.gmra.mrb[14].mxu0 %vm254_vm1, %v5715_v23 }
  0x3c   : > { %4677 = vmatprep.mubr.msk.f32.mxu1 %vm254_vm1, %v5704_v22  ;;  %4903 = vmatprep.mubr.msk.f32.mxu0 %vm254_vm1, %v5718_v24 }
  0x3f   : > { %4678 = vmatmul.mubr.msk.f32.gmra.mrb[16].mxu1 %vm254_vm1, %v5715_v23  ;;  %4904 = vmatmul.mubr.msk.f32.vlgmr.msra.gmra.mrb[0].mxu0 %vm254_vm1, %v5729_v25 }
  0x40   : > { %4952 = vmatpush3.msk.msra.mxu0 %vm351_vm0, %v4181_v9  ;;  %4680 = vmatprep.mubr.msk.f32.mxu1 %vm254_vm1, %v5732_v26  ;;  %v5960_v9 = vld [vmem:[%s5602_s11 + $0x12a] sm:$0xff] }
  0x41   : > { %4906 = vmatprep.mubr.msk.f32.mxu0 %vm254_vm1, %v5735_v27  ;;  %5001 = vmatprep.subr.msk.mxu0 %vm351_vm0, %v5740_v28 }
  0x43   : > { %4681 = vmatmul.mubr.msk.f32.gmra.mrb[18].mxu1 %vm254_vm1, %v5750_v29  ;;  %4907 = vmatmul.mubr.msk.f32.gmra.mrb[2].mxu0 %vm254_vm1, %v5753_v30  ;;  %v6057_v29 = vld [vmem:[%s5602_s11 + $0xd8] sm:$0xff] }
  0x44   : > { %4683 = vmatprep.mubr.msk.f32.mxu1 %vm254_vm1, %v5758_v31  ;;  %4909 = vmatprep.mubr.msk.f32.mxu0 %vm254_vm1, %v5761_v32  ;;  %v6040_v31 = vld [vmem:[%s5602_s11 + $0x18a] sm:$0xff] }
  0x45   : > { %6730 = vst [vmem:[#allocation34_spill] sm:$0xff] %v6040_v31 }
  0x47   : > { %4684 = vmatmul.mubr.msk.f32.gmra.mrb[20].mxu1 %vm254_vm1, %v5774_v33  ;;  %4910 = vmatmul.mubr.msk.f32.gmra.mrb[4].mxu0 %vm254_vm1, %v5777_v34  ;;  %v6026_v33 = vld [vmem:[%s5602_s11 + $0x182] sm:$0xff] }
  0x48   : > { %4686 = vmatprep.mubr.msk.f32.mxu1 %vm254_vm1, %v5780_v35  ;;  %4912 = vmatprep.mubr.msk.f32.mxu0 %vm254_vm1, %v5783_v36  ;;  %v6023_v35 = vld [vmem:[%s5602_s11 + $0xa8] sm:$0xff]  ;;  %6728 = vst [vmem:[#allocation32_spill] sm:$0xff] %v6026_v33 }
  0x49   : > { %6727 = vst [vmem:[#allocation31_spill] sm:$0xff] %v6023_v35 }
  0x4b   : > { %4687 = vmatmul.mubr.msk.f32.gmra.mrb[22].mxu1 %vm254_vm1, %v5794_v37  ;;  %4913 = vmatmul.mubr.msk.f32.gmra.mrb[6].mxu0 %vm254_vm1, %v5797_v38  ;;  %v6020_v37 = vld [vmem:[%s5602_s11 + $0x172] sm:$0xff] }
  0x4c   : > { %4689 = vmatprep.mubr.msk.f32.mxu1 %vm254_vm1, %v5800_v39  ;;  %4915 = vmatprep.mubr.msk.f32.mxu0 %vm254_vm1, %v5803_v40  ;;  %v6017_v39 = vld [vmem:[%s5602_s11 + $0x98] sm:$0xff]  ;;  %6726 = vst [vmem:[#allocation30_spill] sm:$0xff] %v6020_v37 }
  0x4d   : > { %6725 = vst [vmem:[#allocation29_spill] sm:$0xff] %v6017_v39 }
  0x4f   : > { %4690 = vmatmul.mubr.msk.f32.gmra.mrb[24].mxu1 %vm254_vm1, %v5814_v41  ;;  %4916 = vmatmul.mubr.msk.f32.gmra.mrb[8].mxu0 %vm254_vm1, %v5817_v42  ;;  %v6006_v41 = vld [vmem:[%s5602_s11 + $0x16a] sm:$0xff] }
  0x50   : > { %4692 = vmatprep.mubr.msk.f32.mxu1 %vm254_vm1, %v5820_v43  ;;  %4918 = vmatprep.mubr.msk.f32.mxu0 %vm254_vm1, %v5823_v44  ;;  %v6003_v43 = vld [vmem:[%s5602_s11 + $0x90] sm:$0xff] }
  0x51   : > { %6724 = vst [vmem:[#allocation28_spill] sm:$0xff] %v6003_v43 }
  0x53   : > { %4693 = vmatmul.mubr.msk.f32.gmra.mrb[26].mxu1 %vm254_vm1, %v5834_v45  ;;  %4919 = vmatmul.mubr.msk.f32.gmra.mrb[10].mxu0 %vm254_vm1, %v5837_v46  ;;  %v6000_v45 = vld [vmem:[%s5602_s11 + $0x15a] sm:$0xff] }
  0x54   : > { %4695 = vmatprep.mubr.msk.f32.mxu1 %vm254_vm1, %v5840_v47  ;;  %4921 = vmatprep.mubr.msk.f32.mxu0 %vm254_vm1, %v5843_v48  ;;  %v5997_v47 = vld [vmem:[%s5602_s11 + $0x80] sm:$0xff] }
  0x55   : > { %6723 = vst [vmem:[#allocation27_spill] sm:$0xff] %v5997_v47 }
  0x57   : > { %4696 = vmatmul.mubr.msk.f32.gmra.mrb[28].mxu1 %vm254_vm1, %v5854_v49  ;;  %4922 = vmatmul.mubr.msk.f32.gmra.mrb[12].mxu0 %vm254_vm1, %v5857_v50  ;;  %v5986_v49 = vld [vmem:[%s5602_s11 + $0x152] sm:$0xff] }
  0x58   : > { %4698 = vmatprep.mubr.msk.f32.mxu1 %vm254_vm1, %v5860_v51  ;;  %4924 = vmatprep.mubr.msk.f32.mxu0 %vm254_vm1, %v5863_v52  ;;  %v5983_v51 = vld [vmem:[%s5602_s11 + $0x78] sm:$0xff] }
  0x59   : > { %6722 = vst [vmem:[#allocation26_spill] sm:$0xff] %v5983_v51 }
  0x5b   : > { %4699 = vmatmul.mubr.msk.f32.gmra.mrb[30].mxu1 %vm254_vm1, %v5874_v53  ;;  %4925 = vmatmul.mubr.msk.f32.gmra.mrb[14].mxu0 %vm254_vm1, %v5877_v54  ;;  %v5980_v53 = vld [vmem:[%s5602_s11 + $0x142] sm:$0xff] }
  0x5c   : > { %4703 = vmatprep.mubr.msk.f32.mxu1 %vm254_vm1, %v187_v55  ;;  %4927 = vmatprep.mubr.msk.f32.mxu0 %vm254_vm1, %v5881_v56  ;;  %v5966_v55 = vld [vmem:[%s5602_s11 + $0x13a] sm:$0xff] }
  0x5f   : > { %4704 = vmatmul.mubr.msk.f32.vlgmr.msra.gmra.mrb[0].mxu1 %vm254_vm1, %v188_v57  ;;  %4928 = vmatmul.mubr.msk.f32.gmra.mrb[16].mxu0 %vm254_vm1, %v5892_v58  ;;  %v5977_v57 = vld [vmem:[%s5602_s11 + $0x68] sm:$0xff] }
  0x60   : > { %4752 = vmatpush3.msk.msra.mxu1 %vm351_vm0, %v5621_v10  ;;  %4706 = vmatprep.mubr.msk.f32.mxu1 %vm254_vm1, %v5895_v59  ;;  %v5963_v10 = vld [vmem:[%s5602_s11 + $0x60] sm:$0xff]  ;;  %6721 = vst [vmem:[#allocation25_spill] sm:$0xff] %v5977_v57 }
  0x61   : > { %4930 = vmatprep.mubr.msk.f32.mxu0 %vm254_vm1, %v5898_v60  ;;  %4801 = vmatprep.subr.msk.mxu1 %vm351_vm0, %v5903_v61  ;;  %6720 = vst [vmem:[#allocation24_spill] sm:$0xff] %v5963_v10  ;;  %v6043_v59 = vld [vmem:[%s5602_s11 + $0xc0] sm:$0xff] }
  0x63   : > { %4707 = vmatmul.mubr.msk.f32.gmra.mrb[2].mxu1 %vm254_vm1, %v5913_v62  ;;  %4931 = vmatmul.mubr.msk.f32.gmra.mrb[18].mxu0 %vm254_vm1, %v5916_v63  ;;  %v6037_v62 = vld [vmem:[%s5602_s11 + $0xb0] sm:$0xff] }
  0x64   : > { %4709 = vmatprep.mubr.msk.f32.mxu1 %vm254_vm1, %v5921_v0  ;;  %4933 = vmatprep.mubr.msk.f32.mxu0 %vm254_vm1, %v5924_v2  ;;  %6729 = vst [vmem:[#allocation33_spill] sm:$0xff] %v6037_v62 }
  0x67   : > { %4710 = vmatmul.mubr.msk.f32.gmra.mrb[4].mxu1 %vm254_vm1, %v5937_v3  ;;  %4934 = vmatmul.mubr.msk.f32.gmra.mrb[20].mxu0 %vm254_vm1, %v5940_v4 }
  0x68   : > { %4712 = vmatprep.mubr.msk.f32.mxu1 %vm254_vm1, %v5943_v5  ;;  %4936 = vmatprep.mubr.msk.f32.mxu0 %vm254_vm1, %v5946_v6 }
  0x6b   : > { %4713 = vmatmul.mubr.msk.f32.gmra.mrb[6].mxu1 %vm254_vm1, %v5957_v7  ;;  %4937 = vmatmul.mubr.msk.f32.gmra.mrb[22].mxu0 %vm254_vm1, %v5960_v9 }
  0x6c   : > { %4715 = vmatprep.mubr.msk.f32.mxu1 %vm254_vm1, %v5963_v10  ;;  %4939 = vmatprep.mubr.msk.f32.mxu0 %vm254_vm1, %v5966_v55 }
  0x6f   : > { %4716 = vmatmul.mubr.msk.f32.gmra.mrb[8].mxu1 %vm254_vm1, %v5977_v57  ;;  %4940 = vmatmul.mubr.msk.f32.gmra.mrb[24].mxu0 %vm254_vm1, %v5980_v53 }
  0x70   : > { %4718 = vmatprep.mubr.msk.f32.mxu1 %vm254_vm1, %v5983_v51  ;;  %4942 = vmatprep.mubr.msk.f32.mxu0 %vm254_vm1, %v5986_v49 }
  0x73   : > { %4719 = vmatmul.mubr.msk.f32.gmra.mrb[10].mxu1 %vm254_vm1, %v5997_v47  ;;  %4943 = vmatmul.mubr.msk.f32.gmra.mrb[26].mxu0 %vm254_vm1, %v6000_v45 }
  0x74   : > { %4721 = vmatprep.mubr.msk.f32.mxu1 %vm254_vm1, %v6003_v43  ;;  %4945 = vmatprep.mubr.msk.f32.mxu0 %vm254_vm1, %v6006_v41 }
  0x77   : > { %4722 = vmatmul.mubr.msk.f32.gmra.mrb[12].mxu1 %vm254_vm1, %v6017_v39  ;;  %4946 = vmatmul.mubr.msk.f32.gmra.mrb[28].mxu0 %vm254_vm1, %v6020_v37  ;;  %v6062_v37 = vld [vmem:[%s6651_s1 + $0x20] sm:$0xf] }
  0x78   : > { %4724 = vmatprep.mubr.msk.f32.mxu1 %vm254_vm1, %v6023_v35  ;;  %4948 = vmatprep.mubr.msk.f32.mxu0 %vm254_vm1, %v6026_v33  ;;  %v6054_v33 = vld [vmem:[%s5602_s11 + $0xc8] sm:$0xff] }
  0x79   : > { %6731 = vst [vmem:[#allocation35_spill] sm:$0xff] %v6054_v33 }
  0x7b   : > { %4725 = vmatmul.mubr.msk.f32.gmra.mrb[14].mxu1 %vm254_vm1, %v6037_v62  ;;  %4949 = vmatmul.mubr.msk.f32.gmra.mrb[30].mxu0 %vm254_vm1, %v6040_v31  ;;  %v6073_v31 = vld [vmem:[%s5602_s11 + $0xe0] sm:$0xff] }
  0x7c   : > { %4727 = vmatprep.mubr.msk.f32.mxu1 %vm254_vm1, %v6043_v59  ;;  %4953 = vmatprep.mubr.msk.f32.mxu0 %vm254_vm1, %v5921_v0  ;;  %v6078_v0 = vld [vmem:[%s5602_s11 + $0xf0] sm:$0xff] }
  0x7f   : > { %4728 = vmatmul.mubr.msk.f32.gmra.mrb[16].mxu1 %vm254_vm1, %v6054_v33  ;;  %4954 = vmatmul.mubr.msk.f32.vlgmr.msra.gmra.mrb[0].mxu0 %vm254_vm1, %v5937_v3  ;;  %v904_v3 = vld [vmem:[%s5602_s11 + $0x2] sm:$0xff] }
  0x80   : > { %5002 = vmatpush3.msk.msra.mxu0 %vm351_vm0, %v5740_v28  ;;  %4730 = vmatprep.mubr.msk.f32.mxu1 %vm254_vm1, %v6057_v29  ;;  %v6091_v28 = vld [vmem:[%s5602_s11 + $0xf8] sm:$0xff] }
  0x81   : > { %4956 = vmatprep.mubr.msk.f32.mxu0 %vm254_vm1, %v5943_v5  ;;  %5051 = vmatprep.subr.msk.mxu0 %vm351_vm0, %v6062_v37  ;;  %v6094_v5 = vld [vmem:[%s5602_s11 + $0x108] sm:$0xff] }
  0x83   : > { %4731 = vmatmul.mubr.msk.f32.gmra.mrb[18].mxu1 %vm254_vm1, %v6073_v31  ;;  %4957 = vmatmul.mubr.msk.f32.gmra.mrb[2].mxu0 %vm254_vm1, %v5957_v7  ;;  %v6105_v7 = vld [vmem:[%s5602_s11 + $0x110] sm:$0xff] }
  0x84   : > { %4733 = vmatprep.mubr.msk.f32.mxu1 %vm254_vm1, %v6078_v0  ;;  %4959 = vmatprep.mubr.msk.f32.mxu0 %vm254_vm1, %v5963_v10  ;;  %v6108_v10 = vld [vmem:[%s5602_s11 + $0x120] sm:$0xff] }
  0x87   : > { %4734 = vmatmul.mubr.msk.f32.gmra.mrb[20].mxu1 %vm254_vm1, %v6091_v28  ;;  %4960 = vmatmul.mubr.msk.f32.gmra.mrb[4].mxu0 %vm254_vm1, %v5977_v57  ;;  %v6119_v57 = vld [vmem:[%s5602_s11 + $0x128] sm:$0xff] }
  0x88   : > { %4736 = vmatprep.mubr.msk.f32.mxu1 %vm254_vm1, %v6094_v5  ;;  %4962 = vmatprep.mubr.msk.f32.mxu0 %vm254_vm1, %v5983_v51  ;;  %v6122_v51 = vld [vmem:[%s5602_s11 + $0x138] sm:$0xff] }
  0x8b   : > { %4737 = vmatmul.mubr.msk.f32.gmra.mrb[22].mxu1 %vm254_vm1, %v6105_v7  ;;  %4963 = vmatmul.mubr.msk.f32.gmra.mrb[6].mxu0 %vm254_vm1, %v5997_v47  ;;  %v6133_v47 = vld [vmem:[%s5602_s11 + $0x140] sm:$0xff] }
  0x8c   : > { %4739 = vmatprep.mubr.msk.f32.mxu1 %vm254_vm1, %v6108_v10  ;;  %4965 = vmatprep.mubr.msk.f32.mxu0 %vm254_vm1, %v6003_v43  ;;  %v6136_v43 = vld [vmem:[%s5602_s11 + $0x150] sm:$0xff] }
  0x8f   : > { %4740 = vmatmul.mubr.msk.f32.gmra.mrb[24].mxu1 %vm254_vm1, %v6119_v57  ;;  %4966 = vmatmul.mubr.msk.f32.gmra.mrb[8].mxu0 %vm254_vm1, %v6017_v39  ;;  %v6147_v39 = vld [vmem:[%s5602_s11 + $0x158] sm:$0xff] }
  0x90   : > { %4742 = vmatprep.mubr.msk.f32.mxu1 %vm254_vm1, %v6122_v51  ;;  %4968 = vmatprep.mubr.msk.f32.mxu0 %vm254_vm1, %v6023_v35  ;;  %v6150_v35 = vld [vmem:[%s5602_s11 + $0x168] sm:$0xff] }
  0x93   : > { %4743 = vmatmul.mubr.msk.f32.gmra.mrb[26].mxu1 %vm254_vm1, %v6133_v47  ;;  %4969 = vmatmul.mubr.msk.f32.gmra.mrb[10].mxu0 %vm254_vm1, %v6037_v62  ;;  %v6161_v62 = vld [vmem:[%s5602_s11 + $0x170] sm:$0xff] }
  0x94   : > { %4745 = vmatprep.mubr.msk.f32.mxu1 %vm254_vm1, %v6136_v43  ;;  %4971 = vmatprep.mubr.msk.f32.mxu0 %vm254_vm1, %v6043_v59 }
  0x97   : > { %4746 = vmatmul.mubr.msk.f32.gmra.mrb[28].mxu1 %vm254_vm1, %v6147_v39  ;;  %4972 = vmatmul.mubr.msk.f32.gmra.mrb[12].mxu0 %vm254_vm1, %v6054_v33  ;;  %v905_v33 = vld [vmem:[%s5602_s11 + $0xa] sm:$0xff] }
  0x98   : > { %4748 = vmatprep.mubr.msk.f32.mxu1 %vm254_vm1, %v6150_v35  ;;  %4974 = vmatprep.mubr.msk.f32.mxu0 %vm254_vm1, %v6057_v29 }
  0x9b   : > { %4749 = vmatmul.mubr.msk.f32.gmra.mrb[30].mxu1 %vm254_vm1, %v6161_v62  ;;  %4975 = vmatmul.mubr.msk.f32.gmra.mrb[14].mxu0 %vm254_vm1, %v6073_v31 }
  0x9c   : > { %4753 = vmatprep.mubr.msk.f32.mxu1 %vm254_vm1, %v904_v3  ;;  %4977 = vmatprep.mubr.msk.f32.mxu0 %vm254_vm1, %v6078_v0  ;;  %v6748_v3 = vld [vmem:[#allocation25_spill] sm:$0xff] }
  0x9f   : > { %4754 = vmatmul.mubr.msk.f32.vlgmr.msra.gmra.mrb[0].mxu1 %vm254_vm1, %v905_v33  ;;  %4978 = vmatmul.mubr.msk.f32.gmra.mrb[16].mxu0 %vm254_vm1, %v6091_v28  ;;  %v4179_v33 = vld [vmem:[%s5602_s11 + $0x198] sm:$0xff] }
  0xa0   : > { %4802 = vmatpush3.msk.msra.mxu1 %vm351_vm0, %v5903_v61  ;;  %4756 = vmatprep.mubr.msk.f32.mxu1 %vm254_vm1, %v5718_v24  ;;  %v6216_v24 = vld [vmem:[%s5602_s11 + $0x180] sm:$0xff] }
  0xa1   : > { %4980 = vmatprep.mubr.msk.f32.mxu0 %vm254_vm1, %v6094_v5  ;;  %5101 = vmatprep.subr.msk.mxu1 %vm351_vm0, %v5581_v1  ;;  %v4180_v61 = vld [vmem:[%s5602_s11 + $0x1a0] sm:$0xff] }
  0xa3   : > { %4757 = vmatmul.mubr.msk.f32.gmra.mrb[2].mxu1 %vm254_vm1, %v5729_v25  ;;  %4981 = vmatmul.mubr.msk.f32.gmra.mrb[18].mxu0 %vm254_vm1, %v6105_v7  ;;  %v6227_v25 = vld [vmem:[%s5602_s11 + $0x188] sm:$0xff] }
  0xa4   : > { %4759 = vmatprep.mubr.msk.f32.mxu1 %vm254_vm1, %v5735_v27  ;;  %4983 = vmatprep.mubr.msk.f32.mxu0 %vm254_vm1, %v6108_v10 }
  0xa7   : > { %4760 = vmatmul.mubr.msk.f32.gmra.mrb[4].mxu1 %vm254_vm1, %v5753_v30  ;;  %4984 = vmatmul.mubr.msk.f32.gmra.mrb[20].mxu0 %vm254_vm1, %v6119_v57 }
  0xa8   : > { %4762 = vmatprep.mubr.msk.f32.mxu1 %vm254_vm1, %v5761_v32  ;;  %4986 = vmatprep.mubr.msk.f32.mxu0 %vm254_vm1, %v6122_v51 }
  0xab   : > { %4763 = vmatmul.mubr.msk.f32.gmra.mrb[6].mxu1 %vm254_vm1, %v5777_v34  ;;  %4987 = vmatmul.mubr.msk.f32.gmra.mrb[22].mxu0 %vm254_vm1, %v6133_v47 }
  0xac   : > { %4765 = vmatprep.mubr.msk.f32.mxu1 %vm254_vm1, %v5783_v36  ;;  %4989 = vmatprep.mubr.msk.f32.mxu0 %vm254_vm1, %v6136_v43 }
  0xaf   : > { %4766 = vmatmul.mubr.msk.f32.gmra.mrb[8].mxu1 %vm254_vm1, %v5797_v38  ;;  %4990 = vmatmul.mubr.msk.f32.gmra.mrb[24].mxu0 %vm254_vm1, %v6147_v39 }
  0xb0   : > { %4768 = vmatprep.mubr.msk.f32.mxu1 %vm254_vm1, %v5803_v40  ;;  %4992 = vmatprep.mubr.msk.f32.mxu0 %vm254_vm1, %v6150_v35 }
  0xb3   : > { %4769 = vmatmul.mubr.msk.f32.gmra.mrb[10].mxu1 %vm254_vm1, %v5817_v42  ;;  %4993 = vmatmul.mubr.msk.f32.gmra.mrb[26].mxu0 %vm254_vm1, %v6161_v62 }
  0xb4   : > { %4771 = vmatprep.mubr.msk.f32.mxu1 %vm254_vm1, %v5823_v44  ;;  %4995 = vmatprep.mubr.msk.f32.mxu0 %vm254_vm1, %v6216_v24 }
  0xb7   : > { %4772 = vmatmul.mubr.msk.f32.gmra.mrb[12].mxu1 %vm254_vm1, %v5837_v46  ;;  %4996 = vmatmul.mubr.msk.f32.gmra.mrb[28].mxu0 %vm254_vm1, %v6227_v25 }
  0xb8   : > { %4774 = vmatprep.mubr.msk.f32.mxu1 %vm254_vm1, %v5843_v48  ;;  %4998 = vmatprep.mubr.msk.f32.mxu0 %vm254_vm1, %v4179_v33  ;;  %v6749_v33 = vld [vmem:[#allocation13_spill] sm:$0xff] }
  0xbb   : > { %4775 = vmatmul.mubr.msk.f32.gmra.mrb[14].mxu1 %vm254_vm1, %v5857_v50  ;;  %4999 = vmatmul.mubr.msk.f32.gmra.mrb[30].mxu0 %vm254_vm1, %v4180_v61  ;;  %v6750_v61 = vld [vmem:[#allocation26_spill] sm:$0xff] }
  0xbc   : > { %4777 = vmatprep.mubr.msk.f32.mxu1 %vm254_vm1, %v5863_v52  ;;  %5003 = vmatprep.mubr.msk.f32.mxu0 %vm254_vm1, %v5611_v8  ;;  %v6732_v8 = vld [vmem:[#allocation30_spill] sm:$0xff] }
  0xbf   : > { %4778 = vmatmul.mubr.msk.f32.gmra.mrb[16].mxu1 %vm254_vm1, %v5877_v54  ;;  %5004 = vmatmul.mubr.msk.f32.vlgmr.msra.gmra.mrb[0].mxu0 %vm254_vm1, %v5626_v11  ;;  %v6733_v11 = vld [vmem:[#allocation5_spill] sm:$0xff] }
  0xc0   : > { %5052 = vmatpush3.msk.msra.mxu0 %vm351_vm0, %v6062_v37  ;;  %4780 = vmatprep.mubr.msk.f32.mxu1 %vm254_vm1, %v5881_v56  ;;  %v6747_v37 = vld [vmem:[#allocation12_spill] sm:$0xff] }
  0xc1   : > { %5006 = vmatprep.mubr.msk.f32.mxu0 %vm254_vm1, %v5632_v12  ;;  %v6734_v12 = vld [vmem:[#allocation18_spill] sm:$0xff] }
  0xc3   : > { %4781 = vmatmul.mubr.msk.f32.gmra.mrb[18].mxu1 %vm254_vm1, %v5892_v58  ;;  %5007 = vmatmul.mubr.msk.f32.gmra.mrb[2].mxu0 %vm254_vm1, %v5645_v13  ;;  %v6735_v13 = vld [vmem:[#allocation6_spill] sm:$0xff] }
  0xc4   : > { %4783 = vmatprep.mubr.msk.f32.mxu1 %vm254_vm1, %v5898_v60  ;;  %5009 = vmatprep.mubr.msk.f32.mxu0 %vm254_vm1, %v5648_v14  ;;  %v6736_v14 = vld [vmem:[#allocation19_spill] sm:$0xff] }
  0xc7   : > { %4784 = vmatmul.mubr.msk.f32.gmra.mrb[20].mxu1 %vm254_vm1, %v5916_v63  ;;  %5010 = vmatmul.mubr.msk.f32.gmra.mrb[4].mxu0 %vm254_vm1, %v5659_v15  ;;  %v6737_v15 = vld [vmem:[#allocation7_spill] sm:$0xff] }
  0xc8   : > { %4786 = vmatprep.mubr.msk.f32.mxu1 %vm254_vm1, %v5924_v2  ;;  %5012 = vmatprep.mubr.msk.f32.mxu0 %vm254_vm1, %v5662_v16  ;;  %v6738_v16 = vld [vmem:[#allocation20_spill] sm:$0xff] }
  0xcb   : > { %4787 = vmatmul.mubr.msk.f32.gmra.mrb[22].mxu1 %vm254_vm1, %v5940_v4  ;;  %5013 = vmatmul.mubr.msk.f32.gmra.mrb[6].mxu0 %vm254_vm1, %v5673_v17  ;;  %v6739_v17 = vld [vmem:[#allocation8_spill] sm:$0xff] }
  0xcc   : > { %4789 = vmatprep.mubr.msk.f32.mxu1 %vm254_vm1, %v5946_v6  ;;  %5015 = vmatprep.mubr.msk.f32.mxu0 %vm254_vm1, %v5676_v18  ;;  %v6740_v18 = vld [vmem:[#allocation21_spill] sm:$0xff] }
  0xcf   : > { %4790 = vmatmul.mubr.msk.f32.gmra.mrb[24].mxu1 %vm254_vm1, %v5960_v9  ;;  %5016 = vmatmul.mubr.msk.f32.gmra.mrb[8].mxu0 %vm254_vm1, %v5687_v19  ;;  %v6741_v19 = vld [vmem:[#allocation9_spill] sm:$0xff] }
  0xd0   : > { %4792 = vmatprep.mubr.msk.f32.mxu1 %vm254_vm1, %v5966_v55  ;;  %5018 = vmatprep.mubr.msk.f32.mxu0 %vm254_vm1, %v5690_v20  ;;  %v6742_v20 = vld [vmem:[#allocation22_spill] sm:$0xff] }
  0xd3   : > { %4793 = vmatmul.mubr.msk.f32.gmra.mrb[26].mxu1 %vm254_vm1, %v5980_v53  ;;  %5019 = vmatmul.mubr.msk.f32.gmra.mrb[10].mxu0 %vm254_vm1, %v5701_v21  ;;  %v6743_v21 = vld [vmem:[#allocation10_spill] sm:$0xff] }
  0xd4   : > { %4795 = vmatprep.mubr.msk.f32.mxu1 %vm254_vm1, %v5986_v49  ;;  %5021 = vmatprep.mubr.msk.f32.mxu0 %vm254_vm1, %v5704_v22  ;;  %v6745_v22 = vld [vmem:[#allocation11_spill] sm:$0xff] }
  0xd7   : > { %4796 = vmatmul.mubr.msk.f32.gmra.mrb[28].mxu1 %vm254_vm1, %v6000_v45  ;;  %5022 = vmatmul.mubr.msk.f32.gmra.mrb[12].mxu0 %vm254_vm1, %v5715_v23  ;;  %v6746_v23 = vld [vmem:[#allocation24_spill] sm:$0xff] }
  0xd8   : > { %4798 = vmatprep.mubr.msk.f32.mxu1 %vm254_vm1, %v6006_v41  ;;  %5024 = vmatprep.mubr.msk.f32.mxu0 %vm254_vm1, %v5732_v26 }
  0xdb   : > { %4799 = vmatmul.mubr.msk.f32.gmra.mrb[30].mxu1 %vm254_vm1, %v6732_v8  ;;  %5025 = vmatmul.mubr.msk.f32.gmra.mrb[14].mxu0 %vm254_vm1, %v6733_v11  ;;  %v6759_v8 = vld [vmem:[#allocation33_spill] sm:$0xff] }
  0xdc   : > { %4803 = vmatprep.mubr.msk.f32.mxu1 %vm254_vm1, %v6734_v12  ;;  %5027 = vmatprep.mubr.msk.f32.mxu0 %vm254_vm1, %v6735_v13  ;;  %v6751_v12 = vld [vmem:[#allocation14_spill] sm:$0xff] }
  0xdf   : > { %4804 = vmatmul.mubr.msk.f32.vlgmr.msra.gmra.mrb[0].mxu1 %vm254_vm1, %v6736_v14  ;;  %5028 = vmatmul.mubr.msk.f32.gmra.mrb[16].mxu0 %vm254_vm1, %v6737_v15  ;;  %v6752_v14 = vld [vmem:[#allocation27_spill] sm:$0xff] }
  0xe0   : > { %5102 = vmatpush3.msk.msra.mxu1 %vm351_vm0, %v5581_v1  ;;  %4806 = vmatprep.mubr.msk.f32.mxu1 %vm254_vm1, %v6738_v16  ;;  %v6744_v1 = vld [vmem:[#allocation23_spill] sm:$0xff] }
  0xe1   : > { %5030 = vmatprep.mubr.msk.f32.mxu0 %vm254_vm1, %v6739_v17  ;;  %v6753_v16 = vld [vmem:[#allocation15_spill] sm:$0xff] }
  0xe3   : > { %4807 = vmatmul.mubr.msk.f32.gmra.mrb[2].mxu1 %vm254_vm1, %v6740_v18  ;;  %5031 = vmatmul.mubr.msk.f32.gmra.mrb[18].mxu0 %vm254_vm1, %v6741_v19  ;;  %v6754_v18 = vld [vmem:[#allocation28_spill] sm:$0xff] }
  0xe4   : > { %4809 = vmatprep.mubr.msk.f32.mxu1 %vm254_vm1, %v6742_v20  ;;  %5033 = vmatprep.mubr.msk.f32.mxu0 %vm254_vm1, %v6743_v21  ;;  %v6755_v20 = vld [vmem:[#allocation16_spill] sm:$0xff] }
  0xe7   : > { %4810 = vmatmul.mubr.msk.f32.gmra.mrb[4].mxu1 %vm254_vm1, %v6744_v1  ;;  %5034 = vmatmul.mubr.msk.f32.gmra.mrb[20].mxu0 %vm254_vm1, %v6745_v22  ;;  %v6354_v1 = vld [vmem:[%s5602_s11 + $0x181] sm:$0xff] }
  0xe8   : > { %4812 = vmatprep.mubr.msk.f32.mxu1 %vm254_vm1, %v6746_v23  ;;  %5036 = vmatprep.mubr.msk.f32.mxu0 %vm254_vm1, %v6747_v37  ;;  %v6756_v23 = vld [vmem:[#allocation29_spill] sm:$0xff] }
  0xeb   : > { %4813 = vmatmul.mubr.msk.f32.gmra.mrb[6].mxu1 %vm254_vm1, %v6748_v3  ;;  %5037 = vmatmul.mubr.msk.f32.gmra.mrb[22].mxu0 %vm254_vm1, %v6749_v33  ;;  %v6757_v3 = vld [vmem:[#allocation17_spill] sm:$0xff] }
  0xec   : > { %4815 = vmatprep.mubr.msk.f32.mxu1 %vm254_vm1, %v6750_v61  ;;  %5039 = vmatprep.mubr.msk.f32.mxu0 %vm254_vm1, %v6751_v12  ;;  %v6758_v61 = vld [vmem:[#allocation31_spill] sm:$0xff] }
  0xef   : > { %4816 = vmatmul.mubr.msk.f32.gmra.mrb[8].mxu1 %vm254_vm1, %v6752_v14  ;;  %5040 = vmatmul.mubr.msk.f32.gmra.mrb[24].mxu0 %vm254_vm1, %v6753_v16  ;;  %v6365_v14 = vld [vmem:[%s5602_s11 + $0x189] sm:$0xff] }
  0xf0   : > { %4818 = vmatprep.mubr.msk.f32.mxu1 %vm254_vm1, %v6754_v18  ;;  %5042 = vmatprep.mubr.msk.f32.mxu0 %vm254_vm1, %v6755_v20  ;;  %v4245_v18 = vld [vmem:[%s5602_s11 + $0x199] sm:$0xff] }
  0xf3   : > { %4819 = vmatmul.mubr.msk.f32.gmra.mrb[10].mxu1 %vm254_vm1, %v6756_v23  ;;  %5043 = vmatmul.mubr.msk.f32.gmra.mrb[26].mxu0 %vm254_vm1, %v6757_v3  ;;  %v4246_v23 = vld [vmem:[%s5602_s11 + $0x1a1] sm:$0xff]  ;;  %v6760_v3 = vld [vmem:[#allocation35_spill] sm:$0xff] }
  0xf4   : > { %4821 = vmatprep.mubr.msk.f32.mxu1 %vm254_vm1, %v6758_v61  ;;  %5045 = vmatprep.mubr.msk.f32.mxu0 %vm254_vm1, %v6354_v1 }
  0xf7   : > { %4822 = vmatmul.mubr.msk.f32.gmra.mrb[12].mxu1 %vm254_vm1, %v6759_v8  ;;  %5046 = vmatmul.mubr.msk.f32.gmra.mrb[28].mxu0 %vm254_vm1, %v6365_v14 }
  0xf8   : > { %4824 = vmatprep.mubr.msk.f32.mxu1 %vm254_vm1, %v6043_v59  ;;  %5048 = vmatprep.mubr.msk.f32.mxu0 %vm254_vm1, %v4245_v18 }
  0xfb   : > { %4825 = vmatmul.mubr.msk.f32.gmra.mrb[14].mxu1 %vm254_vm1, %v6760_v3  ;;  %5049 = vmatmul.mubr.msk.f32.gmra.mrb[30].mxu0 %vm254_vm1, %v4246_v23 }
  0xfc   : > { %4827 = vmatprep.mubr.msk.f32.mxu1 %vm254_vm1, %v6057_v29  ;;  %5053 = vmatprep.mubr.msk.f32.mxu0 %vm254_vm1, %v5735_v27  ;;  %v6762_v27 = vld [vmem:[#allocation32_spill] sm:$0xff] }
  0xfd   : > { %v4311_v29 = vld [vmem:[%s5602_s11 + $0x19a] sm:$0xff] }
  0xff   : > { %4828 = vmatmul.mubr.msk.f32.gmra.mrb[16].mxu1 %vm254_vm1, %v6073_v31  ;;  %5054 = vmatmul.mubr.msk.f32.vlgmr.msra.gmra.mrb[0].mxu0 %vm254_vm1, %v5753_v30  ;;  %v6763_v30 = vld [vmem:[#allocation17_spill] sm:$0xff]  ;;  %v6764_v31 = vld [vmem:[#allocation34_spill] sm:$0xff] }
 0x100   : > { %4830 = vmatprep.mubr.msk.f32.mxu1 %vm254_vm1, %v6078_v0  ;;  %5056 = vmatprep.mubr.msk.f32.mxu0 %vm254_vm1, %v5761_v32  ;;  %v4312_v32 = vld [vmem:[%s5602_s11 + $0x1a2] sm:$0xff]  ;;  %s3760_s11 = sshll.u32 %s6525_s9, 4  ;;  %s6598_s11 = int_to_ptr.vmem [resolvable:$true] %s3760_s11 }
 0x101   : > { %s5417_s23 = scalar_lea.vmem %s6598_s11, 4096  ;;  %p5424_p1 = scmp.lt.s32.totalorder %s6598_s11, %s5422_s27 }
 0x102   : > { %p5418_p12 = scmp.ne.s32.totalorder %s6598_s11, %s5417_s23  ;;  %p5425_p2 = scmp.lt.s32.totalorder %s5423_s28, %s5417_s23 }
 0x103   : > { %4831 = vmatmul.mubr.msk.f32.gmra.mrb[18].mxu1 %vm254_vm1, %v6091_v28  ;;  %5057 = vmatmul.mubr.msk.f32.gmra.mrb[2].mxu0 %vm254_vm1, %v5777_v34 }
 0x104   : > { %4833 = vmatprep.mubr.msk.f32.mxu1 %vm254_vm1, %v6094_v5  ;;  %5059 = vmatprep.mubr.msk.f32.mxu0 %vm254_vm1, %v5783_v36  ;;  %p5419_p13 = pnand %p5418_p12, %p5560_p4  ;;  %p5426_p3 = por %p5425_p2, %p5424_p1 }
 0x106   : > { %p5420_p0 = pneg %p5419_p13 }
 0x107   : > { %4834 = vmatmul.mubr.msk.f32.gmra.mrb[20].mxu1 %vm254_vm1, %v6105_v7  ;;  %5060 = vmatmul.mubr.msk.f32.gmra.mrb[4].mxu0 %vm254_vm1, %v5797_v38 }
 0x108   : > { %4836 = vmatprep.mubr.msk.f32.mxu1 %vm254_vm1, %v6108_v10  ;;  %5062 = vmatprep.mubr.msk.f32.mxu0 %vm254_vm1, %v5803_v40  ;;  %p5427_p5 = pnand %p5426_p3, %p5420_p0 }
 0x10b   : > { %4837 = vmatmul.mubr.msk.f32.gmra.mrb[22].mxu1 %vm254_vm1, %v6119_v57  ;;  %5063 = vmatmul.mubr.msk.f32.gmra.mrb[6].mxu0 %vm254_vm1, %v5817_v42 }
 0x10c   : > { %4839 = vmatprep.mubr.msk.f32.mxu1 %vm254_vm1, %v6122_v51  ;;  %5065 = vmatprep.mubr.msk.f32.mxu0 %vm254_vm1, %v5823_v44 }
 0x10f   : > { %4840 = vmatmul.mubr.msk.f32.gmra.mrb[24].mxu1 %vm254_vm1, %v6133_v47  ;;  %5066 = vmatmul.mubr.msk.f32.gmra.mrb[8].mxu0 %vm254_vm1, %v5837_v46 }
 0x110   : > { %4842 = vmatprep.mubr.msk.f32.mxu1 %vm254_vm1, %v6136_v43  ;;  %5068 = vmatprep.mubr.msk.f32.mxu0 %vm254_vm1, %v5843_v48 }
 0x113   : > { %4843 = vmatmul.mubr.msk.f32.gmra.mrb[26].mxu1 %vm254_vm1, %v6147_v39  ;;  %5069 = vmatmul.mubr.msk.f32.gmra.mrb[10].mxu0 %vm254_vm1, %v5857_v50 }
 0x114   : > { %4845 = vmatprep.mubr.msk.f32.mxu1 %vm254_vm1, %v6150_v35  ;;  %5071 = vmatprep.mubr.msk.f32.mxu0 %vm254_vm1, %v5863_v52  ;;  %v6519_v52 = vld [vmem:[%s6652_s2] ss:$0 sm:$0xff] }
 0x117   : > { %4846 = vmatmul.mubr.msk.f32.gmra.mrb[28].mxu1 %vm254_vm1, %v6161_v62  ;;  %5072 = vmatmul.mubr.msk.f32.gmra.mrb[12].mxu0 %vm254_vm1, %v5877_v54 }
 0x118   : > { %4848 = vmatprep.mubr.msk.f32.mxu1 %vm254_vm1, %v6216_v24  ;;  %5074 = vmatprep.mubr.msk.f32.mxu0 %vm254_vm1, %v5881_v56 }
 0x11b   : > { %4849 = vmatmul.mubr.msk.f32.gmra.mrb[30].mxu1 %vm254_vm1, %v6227_v25  ;;  %5075 = vmatmul.mubr.msk.f32.gmra.mrb[14].mxu0 %vm254_vm1, %v5892_v58 }
 0x11c   : > { %4877 = vmatprep.mubr.msk.f32.mxu1 %vm254_vm1, %v5732_v26  ;;  %5077 = vmatprep.mubr.msk.f32.mxu0 %vm254_vm1, %v5898_v60  ;;  %v6761_v26 = vld [vmem:[#allocation30_spill] sm:$0xff] }
 0x11f   : > { %4878 = vmatmul.mubr.msk.f32.vlgmr.msra.gmra.mrb[16].mxu1 %vm254_vm1, %v6733_v11  ;;  %5078 = vmatmul.mubr.msk.f32.gmra.mrb[16].mxu0 %vm254_vm1, %v5916_v63 }
 0x120   : > { %4880 = vmatprep.mubr.msk.f32.mxu1 %vm254_vm1, %v6735_v13  ;;  %5080 = vmatprep.mubr.msk.f32.mxu0 %vm254_vm1, %v5924_v2 }
 0x123   : > { %4881 = vmatmul.mubr.msk.f32.gmra.mrb[18].mxu1 %vm254_vm1, %v6737_v15  ;;  %5081 = vmatmul.mubr.msk.f32.gmra.mrb[18].mxu0 %vm254_vm1, %v5940_v4 }
 0x124   : > { %4883 = vmatprep.mubr.msk.f32.mxu1 %vm254_vm1, %v6739_v17  ;;  %5083 = vmatprep.mubr.msk.f32.mxu0 %vm254_vm1, %v5946_v6 }
 0x127   : > { %4884 = vmatmul.mubr.msk.f32.gmra.mrb[20].mxu1 %vm254_vm1, %v6741_v19  ;;  %5084 = vmatmul.mubr.msk.f32.gmra.mrb[20].mxu0 %vm254_vm1, %v5960_v9 }
 0x128   : > { %4886 = vmatprep.mubr.msk.f32.mxu1 %vm254_vm1, %v6743_v21  ;;  %5086 = vmatprep.mubr.msk.f32.mxu0 %vm254_vm1, %v5966_v55 }
 0x12b   : > { %4887 = vmatmul.mubr.msk.f32.gmra.mrb[22].mxu1 %vm254_vm1, %v6745_v22  ;;  %5087 = vmatmul.mubr.msk.f32.gmra.mrb[22].mxu0 %vm254_vm1, %v5980_v53 }
 0x12c   : > { %4889 = vmatprep.mubr.msk.f32.mxu1 %vm254_vm1, %v6747_v37  ;;  %5089 = vmatprep.mubr.msk.f32.mxu0 %vm254_vm1, %v5986_v49 }
 0x12f   : > { %4890 = vmatmul.mubr.msk.f32.gmra.mrb[24].mxu1 %vm254_vm1, %v6749_v33  ;;  %5090 = vmatmul.mubr.msk.f32.gmra.mrb[24].mxu0 %vm254_vm1, %v6000_v45 }
 0x130   : > { %4892 = vmatprep.mubr.msk.f32.mxu1 %vm254_vm1, %v6751_v12  ;;  %5092 = vmatprep.mubr.msk.f32.mxu0 %vm254_vm1, %v6006_v41 }
 0x133   : > { %4893 = vmatmul.mubr.msk.f32.gmra.mrb[26].mxu1 %vm254_vm1, %v6753_v16  ;;  %5093 = vmatmul.mubr.msk.f32.gmra.mrb[26].mxu0 %vm254_vm1, %v6761_v26 }
 0x134   : > { %4895 = vmatprep.mubr.msk.f32.mxu1 %vm254_vm1, %v6755_v20  ;;  %5095 = vmatprep.mubr.msk.f32.mxu0 %vm254_vm1, %v6762_v27 }
 0x137   : > { %4896 = vmatmul.mubr.msk.f32.gmra.mrb[28].mxu1 %vm254_vm1, %v6763_v30  ;;  %5096 = vmatmul.mubr.msk.f32.gmra.mrb[28].mxu0 %vm254_vm1, %v6764_v31 }
 0x138   : > { %4898 = vmatprep.mubr.msk.f32.mxu1 %vm254_vm1, %v6354_v1  ;;  %5098 = vmatprep.mubr.msk.f32.mxu0 %vm254_vm1, %v4311_v29 }
 0x13b   : > { %4899 = vmatmul.mubr.msk.f32.gmra.mrb[30].mxu1 %vm254_vm1, %v6365_v14  ;;  %5099 = vmatmul.mubr.msk.f32.gmra.mrb[30].mxu0 %vm254_vm1, %v4312_v32 }
 0x1b2   : > { %v4805_v34 = vpop.f32.mrb[0].mxu1 }
 0x1b3   : > { %v1496_v35 = vpop.f32.mrb[1].mxu1 }
 0x1b6   : > { %v4808_v36 = vpop.f32.mrb[2].mxu1 }
 0x1b7   : > { %v1506_v38 = vpop.f32.mrb[3].mxu1 }
 0x1ba   : > { %v4811_v39 = vpop.f32.mrb[4].mxu1 }
 0x1bb   : > { %v1516_v40 = vpop.f32.mrb[5].mxu1 }
 0x1be   : > { %v4814_v41 = vpop.f32.mrb[6].mxu1 }
 0x1bf   : > { %v1526_v42 = vpop.f32.mrb[7].mxu1 }
 0x1c2   : > { %v4817_v43 = vpop.f32.mrb[8].mxu1 }
 0x1c3   : > { %v1536_v44 = vpop.f32.mrb[9].mxu1 }
 0x1c6   : > { %v4820_v45 = vpop.f32.mrb[10].mxu1 }
 0x1c7   : > { %v1546_v46 = vpop.f32.mrb[11].mxu1 }
 0x1ca   : > { %v6507_v47 = vpop.f32.mrb[12].mxu1 }
 0x1cb   : > { %v6509_v48 = vpop.f32.mrb[13].mxu1 }
 0x1ce   : > { %v6511_v49 = vpop.f32.mrb[14].mxu1 }
 0x1cf   : > { %v6513_v50 = vpop.f32.mrb[15].mxu1 }
 0x1d2   : > { %v5055_v51 = vpop.f32.mrb[0].mxu0 }
 0x1d3   : > { %v5103_v53 = vadd.f32 %v5055_v51, %v4805_v34  ;;  %v3449_v54 = vpop.f32.mrb[1].mxu0 }
 0x1d4   : > { %v5104_v56 = vadd.f32 %v3449_v54, %v1496_v35 }
 0x1d5   : > { %v3648_v58 = vadd.f32 %v5103_v53, %v6519_v52 }
 0x1d6   : > { %v3647_v59 = vadd.f32 %v5104_v56, %v6519_v52  ;;  %v5058_v60 = vpop.f32.mrb[2].mxu0 }
 0x1d7   : > { %v3680_v62 = vmax.f32 %v3648_v58, 0.0  ;;  %v5105_v63 = vadd.f32 %v5058_v60, %v4808_v36  ;;  %v3459_v0 = vpop.f32.mrb[3].mxu0 }
 0x1d8   : > { %v3679_v2 = vmax.f32 %v3647_v59, 0.0  ;;  %v5106_v4 = vadd.f32 %v3459_v0, %v1506_v38 }
 0x1d9   : > { %3712 = vst [vmem:[%s6525_s9 + $0x8] sm:$0xff] %v3680_v62  ;;  %v3650_v5 = vadd.f32 %v5105_v63, %v6519_v52 }
 0x1da   : > { %3711 = vst [vmem:[%s6525_s9] sm:$0xff] %v3679_v2  ;;  %v3649_v6 = vadd.f32 %v5106_v4, %v6519_v52  ;;  %v5061_v7 = vpop.f32.mrb[4].mxu0 }
 0x1db   : > { %v3682_v9 = vmax.f32 %v3650_v5, 0.0  ;;  %v5107_v10 = vadd.f32 %v5061_v7, %v4811_v39  ;;  %v3469_v55 = vpop.f32.mrb[5].mxu0 }
 0x1dc   : > { %v3681_v57 = vmax.f32 %v3649_v6, 0.0  ;;  %v5108_v28 = vadd.f32 %v3469_v55, %v1516_v40 }
 0x1dd   : > { %3714 = vst [vmem:[%s6525_s9 + $0x18] sm:$0xff] %v3682_v9  ;;  %v3652_v24 = vadd.f32 %v5107_v10, %v6519_v52 }
 0x1de   : > { %3713 = vst [vmem:[%s6525_s9 + $0x10] sm:$0xff] %v3681_v57  ;;  %v3651_v25 = vadd.f32 %v5108_v28, %v6519_v52  ;;  %v5064_v8 = vpop.f32.mrb[6].mxu0 }
 0x1df   : > { %v3684_v11 = vmax.f32 %v3652_v24, 0.0  ;;  %v5109_v13 = vadd.f32 %v5064_v8, %v4814_v41  ;;  %v3479_v15 = vpop.f32.mrb[7].mxu0 }
 0x1e0   : > { %v3683_v17 = vmax.f32 %v3651_v25, 0.0  ;;  %v5110_v19 = vadd.f32 %v3479_v15, %v1526_v42 }
 0x1e1   : > { %3716 = vst [vmem:[%s6525_s9 + $0x28] sm:$0xff] %v3684_v11  ;;  %v3654_v21 = vadd.f32 %v5109_v13, %v6519_v52 }
 0x1e2   : > { %3715 = vst [vmem:[%s6525_s9 + $0x20] sm:$0xff] %v3683_v17  ;;  %v3653_v22 = vadd.f32 %v5110_v19, %v6519_v52  ;;  %v5067_v37 = vpop.f32.mrb[8].mxu0 }
 0x1e3   : > { %v3686_v33 = vmax.f32 %v3654_v21, 0.0  ;;  %v5111_v12 = vadd.f32 %v5067_v37, %v4817_v43  ;;  %v3489_v16 = vpop.f32.mrb[9].mxu0 }
 0x1e4   : > { %v3685_v20 = vmax.f32 %v3653_v22, 0.0  ;;  %v5112_v1 = vadd.f32 %v3489_v16, %v1536_v44 }
 0x1e5   : > { %3718 = vst [vmem:[%s6525_s9 + $0x38] sm:$0xff] %v3686_v33  ;;  %v3656_v3 = vadd.f32 %v5111_v12, %v6519_v52 }
 0x1e6   : > { %3717 = vst [vmem:[%s6525_s9 + $0x30] sm:$0xff] %v3685_v20  ;;  %v3655_v61 = vadd.f32 %v5112_v1, %v6519_v52  ;;  %v5070_v14 = vpop.f32.mrb[10].mxu0 }
 0x1e7   : > { %v3688_v18 = vmax.f32 %v3656_v3, 0.0  ;;  %v5113_v23 = vadd.f32 %v5070_v14, %v4820_v45  ;;  %v3499_v26 = vpop.f32.mrb[11].mxu0 }
 0x1e8   : > { %v3687_v27 = vmax.f32 %v3655_v61, 0.0  ;;  %v5114_v29 = vadd.f32 %v3499_v26, %v1546_v46 }
 0x1e9   : > { %3720 = vst [vmem:[%s6525_s9 + $0x48] sm:$0xff] %v3688_v18  ;;  %v3658_v30 = vadd.f32 %v5113_v23, %v6519_v52 }
 0x1ea   : > { %3719 = vst [vmem:[%s6525_s9 + $0x40] sm:$0xff] %v3687_v27  ;;  %v3657_v31 = vadd.f32 %v5114_v29, %v6519_v52  ;;  %v5073_v32 = vpop.f32.mrb[12].mxu0 }
 0x1eb   : > { %v3690_v34 = vmax.f32 %v3658_v30, 0.0  ;;  %v5115_v35 = vadd.f32 %v5073_v32, %v6507_v47  ;;  %v3509_v36 = vpop.f32.mrb[13].mxu0 }
 0x1ec   : > { %v3689_v38 = vmax.f32 %v3657_v31, 0.0  ;;  %v5116_v39 = vadd.f32 %v3509_v36, %v6509_v48 }
 0x1ed   : > { %3722 = vst [vmem:[%s6525_s9 + $0x58] sm:$0xff] %v3690_v34  ;;  %v3660_v40 = vadd.f32 %v5115_v35, %v6519_v52 }
 0x1ee   : > { %3721 = vst [vmem:[%s6525_s9 + $0x50] sm:$0xff] %v3689_v38  ;;  %v3659_v41 = vadd.f32 %v5116_v39, %v6519_v52  ;;  %v5076_v42 = vpop.f32.mrb[14].mxu0 }
 0x1ef   : > { %v3692_v43 = vmax.f32 %v3660_v40, 0.0  ;;  %v5117_v44 = vadd.f32 %v5076_v42, %v6511_v49  ;;  %v3519_v45 = vpop.f32.mrb[15].mxu0 }
 0x1f0   : > { %v3691_v46 = vmax.f32 %v3659_v41, 0.0  ;;  %v5118_v47 = vadd.f32 %v3519_v45, %v6513_v50 }
 0x1f1   : > { %3724 = vst [vmem:[%s6525_s9 + $0x68] sm:$0xff] %v3692_v43  ;;  %v3662_v51 = vadd.f32 %v5117_v44, %v6519_v52 }
 0x1f2   : > { %3723 = vst [vmem:[%s6525_s9 + $0x60] sm:$0xff] %v3691_v46  ;;  %v3661_v48 = vadd.f32 %v5118_v47, %v6519_v52  ;;  %v4879_v53 = vpop.f32.mrb[16].mxu1  ;;  %v5079_v54 = vpop.f32.mrb[16].mxu0 }
 0x1f3   : > { %v3694_v56 = vmax.f32 %v3662_v51, 0.0  ;;  %v5119_v58 = vadd.f32 %v5079_v54, %v4879_v53  ;;  %v1966_v59 = vpop.f32.mrb[17].mxu1  ;;  %v3529_v60 = vpop.f32.mrb[17].mxu0 }
 0x1f4   : > { %v3693_v49 = vmax.f32 %v3661_v48, 0.0  ;;  %v5120_v62 = vadd.f32 %v3529_v60, %v1966_v59 }
 0x1f5   : > { %3726 = vst [vmem:[%s6525_s9 + $0x78] sm:$0xff] %v3694_v56  ;;  %v3664_v63 = vadd.f32 %v5119_v58, %v6519_v52 }
 0x1f6   : > { %3725 = vst [vmem:[%s6525_s9 + $0x70] sm:$0xff] %v3693_v49  ;;  %v3663_v50 = vadd.f32 %v5120_v62, %v6519_v52  ;;  %v4882_v0 = vpop.f32.mrb[18].mxu1  ;;  %v5082_v2 = vpop.f32.mrb[18].mxu0 }
 0x1f7   : > { %v3696_v4 = vmax.f32 %v3664_v63, 0.0  ;;  %v5121_v5 = vadd.f32 %v5082_v2, %v4882_v0  ;;  %v1976_v6 = vpop.f32.mrb[19].mxu1  ;;  %v3539_v7 = vpop.f32.mrb[19].mxu0 }
 0x1f8   : > { %v3695_v9 = vmax.f32 %v3663_v50, 0.0  ;;  %v5122_v10 = vadd.f32 %v3539_v7, %v1976_v6 }
 0x1f9   : > { %3728 = vst [vmem:[%s6525_s9 + $0x88] sm:$0xff] %v3696_v4  ;;  %v3666_v55 = vadd.f32 %v5121_v5, %v6519_v52 }
 0x1fa   : > { %3727 = vst [vmem:[%s6525_s9 + $0x80] sm:$0xff] %v3695_v9  ;;  %v3665_v57 = vadd.f32 %v5122_v10, %v6519_v52  ;;  %v4885_v28 = vpop.f32.mrb[20].mxu1  ;;  %v5085_v24 = vpop.f32.mrb[20].mxu0 }
 0x1fb   : > { %v3698_v25 = vmax.f32 %v3666_v55, 0.0  ;;  %v5123_v8 = vadd.f32 %v5085_v24, %v4885_v28  ;;  %v1986_v11 = vpop.f32.mrb[21].mxu1  ;;  %v3549_v13 = vpop.f32.mrb[21].mxu0 }
 0x1fc   : > { %v3697_v15 = vmax.f32 %v3665_v57, 0.0  ;;  %v5124_v17 = vadd.f32 %v3549_v13, %v1986_v11 }
 0x1fd   : > { %3730 = vst [vmem:[%s6525_s9 + $0x98] sm:$0xff] %v3698_v25  ;;  %v3668_v19 = vadd.f32 %v5123_v8, %v6519_v52 }
 0x1fe   : > { %3729 = vst [vmem:[%s6525_s9 + $0x90] sm:$0xff] %v3697_v15  ;;  %v3667_v21 = vadd.f32 %v5124_v17, %v6519_v52  ;;  %v4888_v22 = vpop.f32.mrb[22].mxu1  ;;  %v5088_v37 = vpop.f32.mrb[22].mxu0 }
 0x1ff   : > { %v3700_v33 = vmax.f32 %v3668_v19, 0.0  ;;  %v5125_v12 = vadd.f32 %v5088_v37, %v4888_v22  ;;  %v1996_v16 = vpop.f32.mrb[23].mxu1  ;;  %v3559_v20 = vpop.f32.mrb[23].mxu0 }
 0x200   : > { %v3699_v1 = vmax.f32 %v3667_v21, 0.0  ;;  %v5126_v3 = vadd.f32 %v3559_v20, %v1996_v16 }
 0x201   : > { %3732 = vst [vmem:[%s6525_s9 + $0xa8] sm:$0xff] %v3700_v33  ;;  %v3670_v61 = vadd.f32 %v5125_v12, %v6519_v52 }
 0x202   : > { %3731 = vst [vmem:[%s6525_s9 + $0xa0] sm:$0xff] %v3699_v1  ;;  %v3669_v14 = vadd.f32 %v5126_v3, %v6519_v52  ;;  %v4891_v18 = vpop.f32.mrb[24].mxu1  ;;  %v5091_v23 = vpop.f32.mrb[24].mxu0 }
 0x203   : > { %v3702_v26 = vmax.f32 %v3670_v61, 0.0  ;;  %v5127_v27 = vadd.f32 %v5091_v23, %v4891_v18  ;;  %v2006_v29 = vpop.f32.mrb[25].mxu1  ;;  %v3569_v30 = vpop.f32.mrb[25].mxu0 }
 0x204   : > { %v3701_v31 = vmax.f32 %v3669_v14, 0.0  ;;  %v5128_v32 = vadd.f32 %v3569_v30, %v2006_v29 }
 0x205   : > { %3734 = vst [vmem:[%s6525_s9 + $0xb8] sm:$0xff] %v3702_v26  ;;  %v3672_v34 = vadd.f32 %v5127_v27, %v6519_v52 }
 0x206   : > { %3733 = vst [vmem:[%s6525_s9 + $0xb0] sm:$0xff] %v3701_v31  ;;  %v3671_v35 = vadd.f32 %v5128_v32, %v6519_v52  ;;  %v4894_v36 = vpop.f32.mrb[26].mxu1  ;;  %v5094_v38 = vpop.f32.mrb[26].mxu0 }
 0x207   : > { %v3704_v39 = vmax.f32 %v3672_v34, 0.0  ;;  %v5129_v40 = vadd.f32 %v5094_v38, %v4894_v36  ;;  %v2016_v41 = vpop.f32.mrb[27].mxu1  ;;  %v3579_v42 = vpop.f32.mrb[27].mxu0 }
 0x208   : > { %v3703_v43 = vmax.f32 %v3671_v35, 0.0  ;;  %v5130_v44 = vadd.f32 %v3579_v42, %v2016_v41 }
 0x209   : > { %3736 = vst [vmem:[%s6525_s9 + $0xc8] sm:$0xff] %v3704_v39  ;;  %v3674_v45 = vadd.f32 %v5129_v40, %v6519_v52 }
 0x20a   : > { %3735 = vst [vmem:[%s6525_s9 + $0xc0] sm:$0xff] %v3703_v43  ;;  %v3673_v46 = vadd.f32 %v5130_v44, %v6519_v52  ;;  %v4897_v47 = vpop.f32.mrb[28].mxu1  ;;  %v5097_v51 = vpop.f32.mrb[28].mxu0 }
 0x20b   : > { %v3706_v48 = vmax.f32 %v3674_v45, 0.0  ;;  %v5131_v53 = vadd.f32 %v5097_v51, %v4897_v47  ;;  %v2026_v54 = vpop.f32.mrb[29].mxu1  ;;  %v3589_v56 = vpop.f32.mrb[29].mxu0 }
 0x20c   : > { %v3705_v58 = vmax.f32 %v3673_v46, 0.0  ;;  %v5132_v59 = vadd.f32 %v3589_v56, %v2026_v54 }
 0x20d   : > { %3738 = vst [vmem:[%s6525_s9 + $0xd8] sm:$0xff] %v3706_v48  ;;  %v3676_v60 = vadd.f32 %v5131_v53, %v6519_v52 }
 0x20e   : > { %3737 = vst [vmem:[%s6525_s9 + $0xd0] sm:$0xff] %v3705_v58  ;;  %v3675_v49 = vadd.f32 %v5132_v59, %v6519_v52  ;;  %v4900_v62 = vpop.f32.mrb[30].mxu1  ;;  %v5100_v63 = vpop.f32.mrb[30].mxu0 }
 0x20f   : > { %v3708_v50 = vmax.f32 %v3676_v60, 0.0  ;;  %v5133_v0 = vadd.f32 %v5100_v63, %v4900_v62  ;;  %v2036_v2 = vpop.f32.mrb[31].mxu1  ;;  %v3599_v4 = vpop.f32.mrb[31].mxu0 }
 0x210   : > { %v3707_v5 = vmax.f32 %v3675_v49, 0.0  ;;  %v5134_v6 = vadd.f32 %v3599_v4, %v2036_v2 }
 0x211   : > { %3740 = vst [vmem:[%s6525_s9 + $0xe8] sm:$0xff] %v3708_v50  ;;  %v3678_v7 = vadd.f32 %v5133_v0, %v6519_v52 }
 0x212   : > { %3739 = vst [vmem:[%s6525_s9 + $0xe0] sm:$0xff] %v3707_v5  ;;  %v3677_v9 = vadd.f32 %v5134_v6, %v6519_v52 }
 0x213   : > { %v3710_v10 = vmax.f32 %v3678_v7, 0.0 }
 0x214   : > { %v3709_v55 = vmax.f32 %v3677_v9, 0.0 }
 0x215   : > { %3742 = vst [vmem:[%s6525_s9 + $0xf8] sm:$0xff] %v3710_v10 }
 0x216   : > { %3741 = vst [vmem:[%s6525_s9 + $0xf0] sm:$0xff] %v3709_v55 }
 0x217   : > { %5430 = shalt.err (!%p5427_p5)
}
 0x218   : > { %s5431_s29 = scalar_lea.hbm %s6596_s21, 4096  ;;  %s5435_s5 = scalar_lea.hbm %s6653_s3, 8192 }
 0x219   : > { %p5432_p6 = scmp.ne.s32.totalorder %s6596_s21, %s5431_s29  ;;  %p5436_p10 = scmp.lt.u32.totalorder %s6596_s21, %s6653_s3 }
 0x21a   : > { %p5437_p11 = scmp.lt.u32.totalorder %s5435_s5, %s5431_s29  ;;  %p5439_p13 = scmp.lt.u32.totalorder %s5431_s29, %s6596_s21 }
 0x21b   : > { %p5433_p7 = pnand %p5432_p6, %p5560_p4 }
 0x21c   : > { %p5438_p12 = por %p5437_p11, %p5436_p10 }
 0x21d   : > { %p5434_p9 = pneg %p5433_p7 }
 0x21e   : > { %p5440_p0 = por %p5439_p13, %p5438_p12 }
 0x220   : > { %p5441_p1 = pnand %p5440_p0, %p5434_p9 }
 0x222   : > { %5444 = shalt.err (!%p5441_p1)
}
 0x223   : > { %s5498_s8 = smov 128   ;;  %s5499_s9 = smov 8  }
 0x224   : > { %5360 = dma.vmem_to_hbm [thread:$0]  (%p5560_p4), %s6598_s11, 4096, %s6596_s21, %s6604_s15, %s5498_s8, %s5498_s8, %s5499_s9  }
 0x225 PF: > { %p5366_p2 = scmp.ge.s32.totalorder %s5495_s17, 2  ;;  %s3775_s10 = sand.u32 1, %s5475_s12  }
 0x226   : > { %s3776_s18 = scalar_lea.sflag [#allocation3], %s3775_s10 }
 0x227   : > { %p5363_p3 = pnand %p5366_p2, %p5567_p8 }
 0x229   : > { %5470 = dma.done.wait (!%p5363_p3), %s3776_s18, 4096  }
 0x22a   : > { %5472 = vsyncadd (!%p5363_p3), %s3776_s18, 4294963200  ;;  %s16_s17 = sadd.s32 1, %s5495_s17   ;;  %s6765_s12 = smov %s5479_s13 }
 0x22b   : > { %p13_p5 = scmp.ge.s32.totalorder %s16_s17, 4   ;;  %s6766_s13 = smov %s5483_s14 }
 0x22c   : > { %s6767_s14 = smov %s5573_s25  ;;  %s6768_s15 = smov %s5491_s16 }
 0x22d   : > { %s6769_s16 = smov %s6771_s20  ;;  %15 = sbr.rel (!%p13_p5) target bundleno = 4 (0x4), region = 78 }
 0x234   :  { %3781 = vsyncpa [#allocation3], 1 }
 0x235   :  { %3783 = vsyncpa [#allocation3 + $0x1], 1 }

</bundles_post_ra>
